<compile_context>
chip_gen: v7x
topology: tpu7x:2x2x1
jax: 0.10.0
libtpu: 0.0.40
codegen_flags: <defaults>
</compile_context>

<pallas_src>
import functools
import math

import jax
import jax.numpy as jnp
from jax.experimental import pallas as pl
from jax.experimental.pallas import tpu as pltpu


def _const_block_spec(shape):
    """BlockSpec for a block whose index never changes (weights / biases).

    Single-buffered: double-buffering a constant block is pure VMEM waste.
    Falls back to the default pipeline mode on JAX versions without Buffered.
    """
    index_map = lambda *_: (0,) * len(shape)
    try:
        return pl.BlockSpec(shape, index_map, pipeline_mode=pl.Buffered(1))
    except (AttributeError, TypeError):
        return pl.BlockSpec(shape, index_map)


# ---------------------------------------------------------------------------
# Stage 1: fused QKV projection — runs once per token (not once per q-tile).
# ---------------------------------------------------------------------------
def qkv_proj_kernel(x_ref, wqkv_ref, bqkv_ref, q_ref, k_ref, v_ref,
                    *, n_heads, d_k):
    d_model = n_heads * d_k
    x = x_ref[0].astype(jnp.bfloat16)                          # (t, D)
    proj = jnp.dot(x, wqkv_ref[...],
                   preferred_element_type=jnp.float32) + bqkv_ref[...]
    t = proj.shape[0]

    def split_heads(block):                                    # (t, D) -> (H, t, d_k)
        return jnp.transpose(block.reshape(t, n_heads, d_k), (1, 0, 2))

    # 1/sqrt(d_k) was folded into the Q columns of wqkv/bqkv at prepare time.
    q_ref[0] = split_heads(proj[:, :d_model]).astype(jnp.bfloat16)
    k_ref[0] = split_heads(proj[:, d_model:2 * d_model]).astype(jnp.bfloat16)
    v_ref[0] = split_heads(proj[:, 2 * d_model:]).astype(jnp.bfloat16)


# ---------------------------------------------------------------------------
# Stage 2: flash attention (online softmax over KV) + W_o + residual + LN.
# ---------------------------------------------------------------------------
def flash_attn_kernel(xres_ref, q_ref, k_ref, v_ref, wo_ref, bo_ref,
                      gamma_ref, beta_ref, o_ref, m_scr, l_scr, acc_scr,
                      *, eps=1e-5):
    ki = pl.program_id(2)
    nk = pl.num_programs(2)

    @pl.when(ki == 0)
    def _init():
        m_scr[...] = jnp.full_like(m_scr, -jnp.inf)
        l_scr[...] = jnp.zeros_like(l_scr)
        acc_scr[...] = jnp.zeros_like(acc_scr)

    q = q_ref[0]                                               # (H, tq, d_k) bf16, pre-scaled
    k = k_ref[0]                                               # (H, tkv, d_k) bf16
    v = v_ref[0]                                               # (H, tkv, d_k) bf16

    # Head-batched scores on the MXU; softmax math in f32.
    s = jnp.einsum("hqd,hkd->hqk", q, k,
                   preferred_element_type=jnp.float32)         # (H, tq, tkv)

    m_prev = m_scr[...]
    m_new = jnp.maximum(m_prev, jnp.max(s, axis=-1, keepdims=True))
    alpha = jnp.exp(m_prev - m_new)
    p = jnp.exp(s - m_new)
    # TODO(synk): nn.Dropout on attention weights omitted (eval-mode identity).
    l_scr[...] = alpha * l_scr[...] + jnp.sum(p, axis=-1, keepdims=True)
    pv = jnp.einsum("hqk,hkd->hqd", p.astype(jnp.bfloat16), v,
                    preferred_element_type=jnp.float32)        # (H, tq, d_k)
    acc_scr[...] = alpha * acc_scr[...] + pv
    m_scr[...] = m_new

    @pl.when(ki == nk - 1)
    def _finalize():
        ctx = acc_scr[...] * pl.reciprocal(l_scr[...], approx=True)  # (H, tq, d_k)
        n_heads, tq, d_k = ctx.shape
        ctx2 = jnp.transpose(ctx, (1, 0, 2)).reshape(tq, n_heads * d_k)
        out = jnp.dot(ctx2.astype(jnp.bfloat16), wo_ref[...],
                      preferred_element_type=jnp.float32) + bo_ref[...]
        y = out + xres_ref[0]                                  # residual in f32
        mean = jnp.mean(y, axis=-1, keepdims=True)
        var = jnp.mean((y - mean) ** 2, axis=-1, keepdims=True)
        y_hat = (y - mean) * jax.lax.rsqrt(var + eps)
        o_ref[0] = y_hat * gamma_ref[...] + beta_ref[...]


# ---------------------------------------------------------------------------
# One-time parameter preparation (fuse QKV, fold scale, pre-cast to bf16).
# ---------------------------------------------------------------------------
def prepare_params(params, n_heads):
    D = params["wq"].shape[0]
    scale = 1.0 / math.sqrt(D // n_heads)
    wqkv = jnp.concatenate([params["wq"] * scale, params["wk"], params["wv"]],
                           axis=1).astype(jnp.bfloat16)        # (D, 3D) bf16
    bqkv = jnp.concatenate([params["bq"] * scale, params["bk"], params["bv"]],
                           axis=1)                             # (1, 3D) f32
    return {"wqkv": wqkv, "bqkv": bqkv,
            "wo": params["wo"].astype(jnp.bfloat16), "bo": params["bo"],
            "gamma": params["gamma"], "beta": params["beta"]}


def multi_head_attention(x, prepped, n_heads, *, q_tile=256, kv_tile=256,
                         proj_tile=256, vmem_limit_bytes=64 * 1024 * 1024):
    """MultiHeadAttention forward (eval mode). x: (B, S, D) float32."""
    B, S, D = x.shape
    assert D % n_heads == 0
    d_k = D // n_heads
    tq, tkv, tp = min(q_tile, S), min(kv_tile, S), min(proj_tile, S)
    assert S % tq == 0 and S % tkv == 0 and S % tp == 0, \
        "seq_len must be divisible by the tile sizes"

    # ---- Stage 1: fused QKV projection -> head-split bf16 (B, H, S, d_k).
    head_shape = jax.ShapeDtypeStruct((B, n_heads, S, d_k), jnp.bfloat16)
    head_out_spec = pl.BlockSpec((1, n_heads, tp, d_k),
                                 lambda b, si: (b, 0, si, 0))
    qh, kh, vh = pl.pallas_call(
        functools.partial(qkv_proj_kernel, n_heads=n_heads, d_k=d_k),
        out_shape=(head_shape, head_shape, head_shape),
        grid=(B, S // tp),
        in_specs=[pl.BlockSpec((1, tp, D), lambda b, si: (b, si, 0)),
                  _const_block_spec((D, 3 * D)),
                  _const_block_spec((1, 3 * D))],
        out_specs=(head_out_spec, head_out_spec, head_out_spec),
        compiler_params=pltpu.CompilerParams(
            dimension_semantics=("parallel", "parallel"),
            vmem_limit_bytes=vmem_limit_bytes),
    )(x, prepped["wqkv"], prepped["bqkv"])

    # ---- Stage 2: flash attention + W_o + residual + LayerNorm.
    return pl.pallas_call(
        flash_attn_kernel,
        out_shape=jax.ShapeDtypeStruct((B, S, D), jnp.float32),
        grid=(B, S // tq, S // tkv),
        in_specs=[pl.BlockSpec((1, tq, D), lambda b, qi, ki: (b, qi, 0)),   # residual x (f32)
                  pl.BlockSpec((1, n_heads, tq, d_k),
                               lambda b, qi, ki: (b, 0, qi, 0)),            # Q heads (bf16)
                  pl.BlockSpec((1, n_heads, tkv, d_k),
                               lambda b, qi, ki: (b, 0, ki, 0)),            # K heads (bf16)
                  pl.BlockSpec((1, n_heads, tkv, d_k),
                               lambda b, qi, ki: (b, 0, ki, 0)),            # V heads (bf16)
                  _const_block_spec((D, D)),                                # W_o
                  _const_block_spec((1, D)),                                # b_o
                  _const_block_spec((1, D)),                                # ln gamma
                  _const_block_spec((1, D))],                               # ln beta
        out_specs=pl.BlockSpec((1, tq, D), lambda b, qi, ki: (b, qi, 0)),
        scratch_shapes=[pltpu.VMEM((n_heads, tq, 1), jnp.float32),    # running max
                        pltpu.VMEM((n_heads, tq, 1), jnp.float32),    # running denom
                        pltpu.VMEM((n_heads, tq, d_k), jnp.float32)], # context acc
        compiler_params=pltpu.CompilerParams(
            dimension_semantics=("parallel", "parallel", "arbitrary"),
            vmem_limit_bytes=vmem_limit_bytes),
    )(x, qh, kh, vh, prepped["wo"], prepped["bo"],
      prepped["gamma"], prepped["beta"])


def mha_reference(x, params, n_heads):
    """Pure-JAX f32 reference mirroring the PyTorch forward (eval mode)."""
    B, S, D = x.shape
    d_k = D // n_heads

    def lin(t, w, b):
        return jnp.einsum("bsd,de->bse", t, w) + b

    q = lin(x, params["wq"], params["bq"]).reshape(B, S, n_heads, d_k).transpose(0, 2, 1, 3)
    k = lin(x, params["wk"], params["bk"]).reshape(B, S, n_heads, d_k).transpose(0, 2, 1, 3)
    v = lin(x, params["wv"], params["bv"]).reshape(B, S, n_heads, d_k).transpose(0, 2, 1, 3)
    scores = jnp.einsum("bhqd,bhkd->bhqk", q, k) / math.sqrt(d_k)
    attn = jax.nn.softmax(scores, axis=-1)
    ctx = jnp.einsum("bhqk,bhkd->bhqd", attn, v).transpose(0, 2, 1, 3).reshape(B, S, D)
    out = lin(ctx, params["wo"], params["bo"]) + x
    mean = jnp.mean(out, axis=-1, keepdims=True)
    var = jnp.mean((out - mean) ** 2, axis=-1, keepdims=True)
    return (out - mean) / jnp.sqrt(var + 1e-5) * params["gamma"] + params["beta"]


if __name__ == "__main__":
    # Small, lane-dense demo (D multiple of 128); tiles chosen so the flash
    # grid is (B=2, q-tiles=2, kv-tiles=2) to exercise the online-softmax and
    # Q-resident-across-ki paths. Production tiles should be >=128 (v5e) or
    # >=256 (v6e/v7x).
    B, S, D, H = 2, 64, 128, 4

    key = jax.random.PRNGKey(0)
    keys = jax.random.split(key, 11)
    bound = 1.0 / math.sqrt(D)   # matches nn.Linear uniform init scale

    params = {
        "wq": jax.random.uniform(keys[0], (D, D), jnp.float32, -bound, bound),
        "bq": jax.random.uniform(keys[1], (1, D), jnp.float32, -bound, bound),
        "wk": jax.random.uniform(keys[2], (D, D), jnp.float32, -bound, bound),
        "bk": jax.random.uniform(keys[3], (1, D), jnp.float32, -bound, bound),
        "wv": jax.random.uniform(keys[4], (D, D), jnp.float32, -bound, bound),
        "bv": jax.random.uniform(keys[5], (1, D), jnp.float32, -bound, bound),
        "wo": jax.random.uniform(keys[6], (D, D), jnp.float32, -bound, bound),
        "bo": jax.random.uniform(keys[7], (1, D), jnp.float32, -bound, bound),
        "gamma": jax.random.uniform(keys[9], (1, D), jnp.float32, 0.8, 1.2),
        "beta": jax.random.uniform(keys[10], (1, D), jnp.float32, -0.1, 0.1),
    }

    x = jax.random.normal(keys[8], (B, S, D), jnp.float32)

    prepped = prepare_params(params, H)   # one-time: fuse QKV, fold scale, bf16-cast

    out = multi_head_attention(x, prepped, H, q_tile=32, kv_tile=32, proj_tile=64)
    out = jax.block_until_ready(out)

    ref = jax.block_until_ready(mha_reference(x, params, H))
    assert out.shape == (B, S, D)
    # bf16 matmul inputs (f32 accumulation) -> looser tolerance vs f32 reference.
    assert jnp.allclose(out, ref, rtol=2e-2, atol=2e-2), (
        f"max abs err = {jnp.max(jnp.abs(out - ref))}")

    print("KERNEL_OK")
</pallas_src>

<mosaic_0001>
module attributes {stable_mosaic.version = 11 : i64} {
  func.func @qkv_proj_kernel(%arg0: i32, %arg1: i32, %arg2: memref<1x64x128xf32, #tpu.memory_space<vmem>>, %arg3: memref<128x384xbf16, #tpu.memory_space<vmem>>, %arg4: memref<1x384xf32, #tpu.memory_space<vmem>>, %arg5: memref<1x4x64x32xbf16, #tpu.memory_space<vmem>>, %arg6: memref<1x4x64x32xbf16, #tpu.memory_space<vmem>>, %arg7: memref<1x4x64x32xbf16, #tpu.memory_space<vmem>>) attributes {dimension_semantics = [#tpu.dimension_semantics<parallel>, #tpu.dimension_semantics<parallel>], iteration_bounds = array<i64: 2, 1>, scalar_prefetch = 0 : i64, scratch_operands = 0 : i64, tpu.core_type = #tpu.core_type<tc>, window_params = [{transform_indices = @transform_0, window_bounds = array<i64: 1, 64, 128>}, {pipeline_mode = #tpu.pipeline_mode<synchronous>, transform_indices = @transform_1, window_bounds = array<i64: 128, 384>}, {pipeline_mode = #tpu.pipeline_mode<synchronous>, transform_indices = @transform_2, window_bounds = array<i64: 1, 384>}, {transform_indices = @transform_3, window_bounds = array<i64: 1, 4, 64, 32>}, {transform_indices = @transform_4, window_bounds = array<i64: 1, 4, 64, 32>}, {transform_indices = @transform_5, window_bounds = array<i64: 1, 4, 64, 32>}]} {
    %c0 = arith.constant 0 : index
    %c0_0 = arith.constant 0 : index
    %c0_1 = arith.constant 0 : index
    %0 = vector.load %arg2[%c0, %c0_0, %c0_1] : memref<1x64x128xf32, #tpu.memory_space<vmem>>, vector<1x64x128xf32>
    %1 = vector.shape_cast %0 : vector<1x64x128xf32> to vector<64x128xf32>
    %2 = arith.truncf %1 : vector<64x128xf32> to vector<64x128xbf16>
    %c0_2 = arith.constant 0 : index
    %c0_3 = arith.constant 0 : index
    %3 = vector.load %arg3[%c0_2, %c0_3] : memref<128x384xbf16, #tpu.memory_space<vmem>>, vector<128x384xbf16>
    %cst = arith.constant dense<0.000000e+00> : vector<64x384xf32>
    %4 = tpu.matmul %2, %3, %cst {dimension_numbers = #tpu.dot_dimension_numbers<[1], [0], [0], [1], [0, 0, 1, 1], [], []>} : vector<64x128xbf16>, vector<128x384xbf16>, vector<64x384xf32> -> vector<64x384xf32>
    %c0_4 = arith.constant 0 : index
    %c0_5 = arith.constant 0 : index
    %5 = vector.load %arg4[%c0_4, %c0_5] : memref<1x384xf32, #tpu.memory_space<vmem>>, vector<1x384xf32>
    %6 = vector.broadcast %5 : vector<1x384xf32> to vector<64x384xf32>
    %7 = arith.addf %4, %6 : vector<64x384xf32>
    %8 = vector.extract_strided_slice %7 {offsets = [0, 0], sizes = [64, 128], strides = [1, 1]} : vector<64x384xf32> to vector<64x128xf32>
    %9 = vector.shape_cast %8 : vector<64x128xf32> to vector<64x4x32xf32>
    %10 = tpu.transpose %9, [1, 0, 2] : vector<64x4x32xf32> -> vector<4x64x32xf32>
    %11 = arith.truncf %10 : vector<4x64x32xf32> to vector<4x64x32xbf16>
    %c0_6 = arith.constant 0 : index
    %c0_7 = arith.constant 0 : index
    %c0_8 = arith.constant 0 : index
    %c0_9 = arith.constant 0 : index
    %12 = vector.load %arg5[%c0_6, %c0_7, %c0_8, %c0_9] : memref<1x4x64x32xbf16, #tpu.memory_space<vmem>>, vector<1x4x64x32xbf16>
    %13 = vector.shape_cast %12 : vector<1x4x64x32xbf16> to vector<4x64x32xbf16>
    %14 = vector.shape_cast %11 : vector<4x64x32xbf16> to vector<1x4x64x32xbf16>
    tpu.vector_store %arg5[%c0_6, %c0_7, %c0_8, %c0_9], %14 {strides = array<i32>} : memref<1x4x64x32xbf16, #tpu.memory_space<vmem>>, vector<1x4x64x32xbf16>,
    %15 = vector.extract_strided_slice %7 {offsets = [0, 128], sizes = [64, 128], strides = [1, 1]} : vector<64x384xf32> to vector<64x128xf32>
    %16 = vector.shape_cast %15 : vector<64x128xf32> to vector<64x4x32xf32>
    %17 = tpu.transpose %16, [1, 0, 2] : vector<64x4x32xf32> -> vector<4x64x32xf32>
    %18 = arith.truncf %17 : vector<4x64x32xf32> to vector<4x64x32xbf16>
    %c0_10 = arith.constant 0 : index
    %c0_11 = arith.constant 0 : index
    %c0_12 = arith.constant 0 : index
    %c0_13 = arith.constant 0 : index
    %19 = vector.load %arg6[%c0_10, %c0_11, %c0_12, %c0_13] : memref<1x4x64x32xbf16, #tpu.memory_space<vmem>>, vector<1x4x64x32xbf16>
    %20 = vector.shape_cast %19 : vector<1x4x64x32xbf16> to vector<4x64x32xbf16>
    %21 = vector.shape_cast %18 : vector<4x64x32xbf16> to vector<1x4x64x32xbf16>
    tpu.vector_store %arg6[%c0_10, %c0_11, %c0_12, %c0_13], %21 {strides = array<i32>} : memref<1x4x64x32xbf16, #tpu.memory_space<vmem>>, vector<1x4x64x32xbf16>,
    %22 = vector.extract_strided_slice %7 {offsets = [0, 256], sizes = [64, 128], strides = [1, 1]} : vector<64x384xf32> to vector<64x128xf32>
    %23 = vector.shape_cast %22 : vector<64x128xf32> to vector<64x4x32xf32>
    %24 = tpu.transpose %23, [1, 0, 2] : vector<64x4x32xf32> -> vector<4x64x32xf32>
    %25 = arith.truncf %24 : vector<4x64x32xf32> to vector<4x64x32xbf16>
    %c0_14 = arith.constant 0 : index
    %c0_15 = arith.constant 0 : index
    %c0_16 = arith.constant 0 : index
    %c0_17 = arith.constant 0 : index
    %26 = vector.load %arg7[%c0_14, %c0_15, %c0_16, %c0_17] : memref<1x4x64x32xbf16, #tpu.memory_space<vmem>>, vector<1x4x64x32xbf16>
    %27 = vector.shape_cast %26 : vector<1x4x64x32xbf16> to vector<4x64x32xbf16>
    %28 = vector.shape_cast %25 : vector<4x64x32xbf16> to vector<1x4x64x32xbf16>
    tpu.vector_store %arg7[%c0_14, %c0_15, %c0_16, %c0_17], %28 {strides = array<i32>} : memref<1x4x64x32xbf16, #tpu.memory_space<vmem>>, vector<1x4x64x32xbf16>,
    return
  }
  func.func @transform_0(%arg0: i32, %arg1: i32) -> (i32, i32, i32) {
    %c0_i32 = arith.constant 0 : i32
    %c0_i32_0 = arith.constant 0 : i32
    return %arg0, %arg1, %c0_i32 : i32, i32, i32
  }
  func.func @transform_1(%arg0: i32, %arg1: i32) -> (i32, i32) {
    %c0_i32 = arith.constant 0 : i32
    %c0_i32_0 = arith.constant 0 : i32
    %c0_i32_1 = arith.constant 0 : i32
    return %c0_i32, %c0_i32_0 : i32, i32
  }
  func.func @transform_2(%arg0: i32, %arg1: i32) -> (i32, i32) {
    %c0_i32 = arith.constant 0 : i32
    %c0_i32_0 = arith.constant 0 : i32
    %c0_i32_1 = arith.constant 0 : i32
    return %c0_i32, %c0_i32_0 : i32, i32
  }
  func.func @transform_3(%arg0: i32, %arg1: i32) -> (i32, i32, i32, i32) {
    %c0_i32 = arith.constant 0 : i32
    %c0_i32_0 = arith.constant 0 : i32
    %c0_i32_1 = arith.constant 0 : i32
    return %arg0, %c0_i32, %arg1, %c0_i32_0 : i32, i32, i32, i32
  }
  func.func @transform_4(%arg0: i32, %arg1: i32) -> (i32, i32, i32, i32) {
    %c0_i32 = arith.constant 0 : i32
    %c0_i32_0 = arith.constant 0 : i32
    %c0_i32_1 = arith.constant 0 : i32
    return %arg0, %c0_i32, %arg1, %c0_i32_0 : i32, i32, i32, i32
  }
  func.func @transform_5(%arg0: i32, %arg1: i32) -> (i32, i32, i32, i32) {
    %c0_i32 = arith.constant 0 : i32
    %c0_i32_0 = arith.constant 0 : i32
    %c0_i32_1 = arith.constant 0 : i32
    return %arg0, %c0_i32, %arg1, %c0_i32_0 : i32, i32, i32, i32
  }
}

</mosaic_0001>

<bundles_post_ra>
// kernel: tpu_custom_call.1
= control target key start
LH: loop header
LB: loop body
LE: loop exit
PB: predicated region body
PF: predicated region fallthrough
CT: control target
= control target key end

     0   :  { %11 = vsyncpa [#allocation3], 0  ;;  %s7179_s0 = inlined_call_operand.hbm [shape: f32[2,64,128], index: 0, kind: input, shape index: {}]   ;;  %s7180_s1 = inlined_call_operand.hbm [shape: bf16[128,384], index: 1, kind: input, shape index: {}]   ;;  %s7181_s2 = inlined_call_operand.hbm [shape: f32[1,384], index: 2, kind: input, shape index: {}]   ;;  %s7182_s3 = inlined_call_operand.hbm [shape: bf16[2,4,64,32], index: 3, kind: output, shape index: {0}]   ;;  %s7183_s4 = inlined_call_operand.hbm [shape: bf16[2,4,64,32], index: 4, kind: output, shape index: {1}]   ;;  %s7184_s5 = inlined_call_operand.hbm [shape: bf16[2,4,64,32], index: 5, kind: output, shape index: {2}]  }
   0x1   :  { %13 = vsyncpa [#allocation3 + $0x1], 0 }
   0x2   :  { %14 = vsyncpa [#allocation6], 0 }
   0x3   :  { %15 = vsyncpa [#allocation4], 0 }
   0x4   :  { %17 = vsyncpa [#allocation4 + $0x1], 0 }
   0x5   :  { %18 = vsyncpa [#allocation10], 0 }
   0x6   :  { %20 = vsyncpa [#allocation10 + $0x1], 0  ;;  %s5610_s18 = smov 0   ;;  %s5612_s19 = smov 0  }
   0x7   :  { %s5614_s20 = smov 0   ;;  %s5616_s21 = smov 0  }
   0x8   :  { %s5618_s22 = smov 0   ;;  %s5620_s23 = smov 0  }
   0x9 LB: > { %s5641_s24 = sadd.s32 4294967295, %s5561_s23   ;;  %s7188_s25 = sadd.s32 4294967294, %s5561_s23   ;;  %s5561_s23 = sphi %s5620_s23, %s26_s23   ;;  %s5557_s22 = sphi %s5618_s22, %s7208_s22   ;;  %s5553_s21 = sphi %s5616_s21, %s7207_s21   ;;  %s5549_s20 = sphi %s5614_s20, %s7206_s20   ;;  %s5545_s19 = sphi %s5612_s19, %s7205_s19   ;;  %s5541_s18 = sphi %s5610_s18, %s7204_s18  }
   0xa   : > { %p60_p0 = scmp.ne.s32.totalorder %s5545_s19, %s5541_s18  ;;  %p7185_p1 = scmp.eq.s32.totalorder %s5641_s24, 0 }
   0xb   : > { %p134_p3 = scmp.eq.s32.totalorder %s7188_s25, 1  ;;  %p4864_p5 = scmp.ge.s32.totalorder %s5561_s23, 1 }
   0xc   : > { %p5652_p4 = por %p7185_p1, %p60_p0  ;;  %p197_p7 = scmp.lt.s32.totalorder %s5561_s23, 3 }
   0xd   : > { %p5657_p6 = por %p134_p3, %p60_p0  ;;  %s5563_s29 = smov [#allocation5]  }
   0xe   : > { %s7189_s26 = scalar_select %p5652_p4, 1, 0 }
   0xf   : > { %s7190_s27 = scalar_select %p5657_p6, 1, 0 }
  0x10   : > { %p5662_p8 = pnand %p4864_p5, %p197_p7  ;;  %s209_s30 = sshll.u32 %s5563_s29, 4  ;;  %s5666_s30 = int_to_ptr.vmem [resolvable:$true] %s209_s30 }
  0x11   : > { %s5564_s7 = smov [#allocation7]   ;;  %s5329_s11 = scalar_lea.hbm %s7180_s1, 3072 }
  0x12   : > { %p5209_p9 = pneg %p5662_p8  ;;  %s223_s8 = sshll.u32 %s5564_s7, 4  ;;  %s5677_s8 = int_to_ptr.vmem [resolvable:$true] %s223_s8 }
  0x13   : > { %p5330_p12 = scmp.ne.s32.totalorder %s7180_s1, %s5329_s11  ;;  %p5336_p5 = scmp.lt.u32.totalorder %s5329_s11, %s7180_s1 }
  0x14   : > { %p5673_p11 = pnand %p5209_p9, %p7185_p1 }
  0x16   : > { %p5331_p13 = pneg %p5673_p11 }
  0x18   : > { %p5332_p0 = pnand %p5331_p13, %p5330_p12 }
  0x1a   : > { %p5333_p3 = pneg %p5332_p0 }
  0x1c   : > { %p5338_p7 = pnand %p5336_p5, %p5333_p3 }
  0x1e   : > { %5341 = shalt.err (!%p5338_p7)
}
  0x1f   : > { %s5342_s16 = scalar_lea.vmem %s5666_s30, 3072  ;;  %p5350_p2 = scmp.lt.s32.totalorder %s5666_s30, %s5666_s30 }
  0x20   : > { %p5343_p9 = scmp.ne.s32.totalorder %s5666_s30, %s5342_s16  ;;  %p5351_p12 = scmp.lt.s32.totalorder %s5342_s16, %s5342_s16 }
  0x22   : > { %p5345_p10 = pnand %p5343_p9, %p5331_p13  ;;  %p5352_p0 = por %p5351_p12, %p5350_p2 }
  0x24   : > { %p5346_p1 = pneg %p5345_p10 }
  0x26   : > { %p5353_p6 = pnand %p5352_p0, %p5346_p1 }
  0x28   : > { %5356 = shalt.err (!%p5353_p6)
}
  0x29   : > { %s5565_s17 = smov 192   ;;  %s5566_s29 = smov 12  }
  0x2a   : > { %5212 = dma.hbm_to_vmem [thread:$0]  (!%p5673_p11), %s7180_s1, 3072, %s5666_s30, [#allocation6], %s5565_s17, %s5565_s17, %s5566_s29  }
  0x2b   : > { %s5357_s12 = scalar_lea.hbm %s7181_s2, 48 }
  0x2c   : > { %p5358_p2 = scmp.ne.s32.totalorder %s7181_s2, %s5357_s12  ;;  %p5364_p10 = scmp.lt.u32.totalorder %s5357_s12, %s7181_s2 }
  0x2e   : > { %p5360_p1 = pnand %p5358_p2, %p5331_p13 }
  0x30   : > { %p5361_p6 = pneg %p5360_p1 }
  0x32   : > { %p5366_p3 = pnand %p5364_p10, %p5361_p6 }
  0x34   : > { %5369 = shalt.err (!%p5366_p3)
}
  0x35   : > { %s5370_s30 = scalar_lea.vmem %s5677_s8, 48  ;;  %s5377_s17 = scalar_lea.vmem %s5677_s8, 64 }
  0x36   : > { %p5371_p5 = scmp.ne.s32.totalorder %s5677_s8, %s5370_s30  ;;  %p5378_p12 = scmp.lt.s32.totalorder %s5677_s8, %s5677_s8 }
  0x37   : > { %p5379_p0 = scmp.lt.s32.totalorder %s5377_s17, %s5370_s30 }
  0x38   : > { %p5373_p7 = pnand %p5371_p5, %p5331_p13 }
  0x39   : > { %p5380_p2 = por %p5379_p0, %p5378_p12 }
  0x3a   : > { %p5374_p9 = pneg %p5373_p7 }
  0x3c   : > { %p5381_p1 = pnand %p5380_p2, %p5374_p9 }
  0x3e   : > { %5384 = shalt.err (!%p5381_p1)
}
  0x3f   : > { %5215 = dma.hbm_to_vmem [thread:$0]  (!%p5673_p11), %s7181_s2, 48, %s5677_s8, [#allocation6]  }
  0x40   : > { %s38_s9 = sadd.s32 1, %s5557_s22  ;;  %s47_s10 = sadd.s32 1, %s5549_s20 }
  0x41   : > { %p40_p13 = scmp.ge.s32.totalorder %s38_s9, 2  ;;  %p54_p6 = scmp.ne.s32.totalorder %s5549_s20, %s5545_s19 }
  0x42   : > { %p55_p10 = scmp.eq.s32.totalorder %s5561_s23, 0  ;;  %p5232_p3 = scmp.lt.s32.totalorder %s5561_s23, 2 }
  0x43   : > { %s7210_s9 = smov (%p40_p13, %s38_s9), 0  ;;  %p7193_p7 = scmp.eq.s32.totalorder %s5641_s24, 1 }
  0x44   : > { %p56_p5 = por %p55_p10, %p54_p6  ;;  %s42_s11 = ssub.s32 %s5557_s22, %s7210_s9 }
  0x45   : > { %p5742_p9 = por %p7193_p7, %p54_p6  ;;  %s234_s12 = sand.u32 1, %s5549_s20  }
  0x46   : > { %p45_p12 = scmp.eq.s32.totalorder %s42_s11, 0  ;;  %s4868_s8 = sshll.u32 %s234_s12, 6 }
  0x47   : > { %s7194_s6 = scalar_select %p5742_p9, 1, 0 }
  0x48   : > { %s5057_s13 = sshll.u32 %s5557_s22, 10  ;;  %s238_s17 = scalar_lea.vmem [#allocation2], %s4868_s8 }
  0x49   : > { %s5751_s14 = scalar_select %p45_p12, %s5549_s20, %s47_s10  }
  0x4a   : > { %s5756_s30 = scalar_lea.hbm %s7179_s0, %s5057_s13  ;;  %s247_s29 = sshll.u32 %s238_s17, 4  ;;  %s5764_s29 = int_to_ptr.vmem [resolvable:$true] %s247_s29 }
  0x4b   : > { %p5760_p11 = pnand %p5232_p3, %p56_p5  ;;  %s5766_s10 = scalar_lea.sflag [#allocation3], %s234_s12 }
  0x4c   : > { %s5385_s11 = scalar_lea.hbm %s5756_s30, 1024  ;;  %s5390_s15 = scalar_lea.hbm %s7179_s0, 2048 }
  0x4d   : > { %p5386_p0 = scmp.ne.s32.totalorder %s5756_s30, %s5385_s11  ;;  %p5387_p2 = pneg %p5760_p11 }
  0x4e   : > { %p5391_p6 = scmp.lt.u32.totalorder %s5756_s30, %s7179_s0  ;;  %p5392_p10 = scmp.lt.u32.totalorder %s5390_s15, %s5385_s11 }
  0x4f   : > { %p5388_p1 = pnand %p5387_p2, %p5386_p0  ;;  %p5394_p5 = scmp.lt.u32.totalorder %s5385_s11, %s5756_s30 }
  0x50   : > { %p5393_p3 = por %p5392_p10, %p5391_p6 }
  0x51   : > { %p5389_p13 = pneg %p5388_p1 }
  0x52   : > { %p5395_p7 = por %p5394_p5, %p5393_p3 }
  0x54   : > { %p5396_p12 = pnand %p5395_p7, %p5389_p13 }
  0x56   : > { %5399 = shalt.err (!%p5396_p12)
}
  0x57   : > { %s5400_s12 = scalar_lea.vmem %s5764_s29, 1024  ;;  %s5567_s8 = smov [#allocation2]  }
  0x58   : > { %p5401_p0 = scmp.ne.s32.totalorder %s5764_s29, %s5400_s12  ;;  %s5405_s13 = sshll.u32 %s5567_s8, 4  ;;  %s5406_s13 = int_to_ptr.vmem [resolvable:$false] %s5405_s13 }
  0x59   : > { %s5407_s16 = scalar_lea.vmem %s5406_s13, 2048  ;;  %p5408_p4 = scmp.lt.s32.totalorder %s5764_s29, %s5406_s13 }
  0x5a   : > { %p5403_p1 = pnand %p5401_p0, %p5387_p2  ;;  %p5409_p6 = scmp.lt.s32.totalorder %s5407_s16, %s5400_s12 }
  0x5c   : > { %p5404_p9 = pneg %p5403_p1  ;;  %p5410_p10 = por %p5409_p6, %p5408_p4 }
  0x5e   : > { %p5411_p3 = pnand %p5410_p10, %p5404_p9 }
  0x60   : > { %5414 = shalt.err (!%p5411_p3)
}
  0x61   : > { %s5568_s11 = smov 128   ;;  %s5569_s15 = smov 8  }
  0x62   : > { %5219 = dma.hbm_to_vmem [thread:$0]  (!%p5760_p11), %s5756_s30, 1024, %s5764_s29, %s5766_s10, %s5568_s11, %s5568_s11, %s5569_s15  }
  0x63   : > { %259 = sbr.rel (%p5662_p8) target bundleno = 782 (0x30e), region = 32  ;;  %s5797_s17 = sand.u32 (!%p5662_p8), 1, %s5545_s19  }
  0x64   : > { %s4872_s12 = sshll.u32 (!%p5662_p8), %s5797_s17, 6  ;;  %s262_s8 = scalar_lea.sflag (!%p5662_p8), [#allocation3], %s5797_s17 }
  0x65   : > { %s5801_s13 = scalar_lea.vmem (!%p5662_p8), [#allocation2], %s4872_s12  ;;  %p7196_p4 = scmp.ne.s32.totalorder (!%p5662_p8), %s7189_s26, 0 }
  0x6a   : > { %5524 = dma.done.wait (%p7196_p4), %s262_s8, 1024  }
  0x6b   : > { %5526 = vsyncadd (%p7196_p4), %s262_s8, 4294966272  ;;  %p7197_p9 = scmp.eq.s32.totalorder %s5641_s24, 0 }
  0x6d   : > { %5528 = dma.done.wait (%p7197_p9), [#allocation6], 3120   ;;  %p7198_p8 = pmov %p7197_p9 }
  0x6e   : > { %v5570_v0 = vmov 0   ;;  %v5297_v1 = vld [vmem:[#allocation5 + $0x4] ss:$12 sps:$4 sm:$0xff]   ;;  %v5299_v2 = vld [vmem:[#allocation5] ss:$12 sps:$4 sm:$0xff]   ;;  %v318_v29 = vld [vmem:[%s5801_s13 + $0x18] sm:$0xff]  ;;  %v361_v37 = vlaneseq }
  0x6f   : > { %5530 = vsyncadd (%p7198_p8), [#allocation6], 4294964176  ;;  %536 = vmatprep.mubr.bf16.mxu0 %v5570_v0  ;;  %504 = vmatprep.subr.bf16.mxu0 %v5297_v1  ;;  %v5300_v3 = vld [vmem:[#allocation5 + $0x1c] ss:$12 sps:$4 sm:$0xff]   ;;  %v5302_v4 = vld [vmem:[#allocation5 + $0x18] ss:$12 sps:$4 sm:$0xff]  }
  0x70   : > { %505 = vmatpush1.bf16.msra.mxu0 %v5299_v2  ;;  %v5303_v5 = vld [vmem:[#allocation5 + $0x8] ss:$12 sps:$4 sm:$0xff]   ;;  %v5307_v7 = vld [vmem:[#allocation5 + $0x20] ss:$12 sps:$4 sm:$0xff]   ;;  %v5306_v8 = vld [vmem:[#allocation5 + $0x30] ss:$12 sps:$4 sm:$0xff]  }
  0x71   : > { %506 = vmatprep.subr.bf16.mxu0 %v5300_v3  ;;  %v5304_v6 = vld [vmem:[#allocation5 + $0x34] ss:$12 sps:$4 sm:$0xff]   ;;  %5169 = vmatprep.subr.bf16.mxu1 %v5303_v5  ;;  %v5308_v9 = vld [vmem:[#allocation5 + $0x4c] ss:$12 sps:$4 sm:$0xff]   ;;  %v5315_v12 = vld [vmem:[#allocation5 + $0x50] ss:$12 sps:$4 sm:$0xff]  }
  0x72   : > { %5170 = vmatpush3.bf16.msra.mxu1 %v5303_v5  ;;  %v5311_v10 = vld [vmem:[#allocation5 + $0x38] ss:$12 sps:$4 sm:$0xff]   ;;  %v5310_v11 = vld [vmem:[#allocation5 + $0x48] ss:$12 sps:$4 sm:$0xff]   ;;  %v5314_v14 = vld [vmem:[#allocation5 + $0x60] ss:$12 sps:$4 sm:$0xff]  }
  0x73   : > { %5171 = vmatprep.subr.bf16.mxu1 %v5307_v7  ;;  %v5312_v13 = vld [vmem:[#allocation5 + $0x64] ss:$12 sps:$4 sm:$0xff]   ;;  %v5319_v15 = vld [vmem:[#allocation5 + $0x68] ss:$12 sps:$4 sm:$0xff]   ;;  %v5323_v20 = vld [vmem:[#allocation5 + $0x80] ss:$12 sps:$4 sm:$0xff]  }
  0x74   : > { %507 = vmatpush1.bf16.msra.mxu0 %v5302_v4  ;;  %v5316_v16 = vld [vmem:[#allocation5 + $0x7c] ss:$12 sps:$4 sm:$0xff]   ;;  %v315_v17 = vld [vmem:[%s5801_s13] sm:$0xff]  ;;  %v5324_v25 = vld [vmem:[#allocation5 + $0xac] ss:$12 sps:$4 sm:$0xff]   ;;  %v5823_v38 = vshrl.u32 %v361_v37, 7 }
  0x75   : > { %508 = vmatprep.subr.bf16.mxu0 %v5304_v6  ;;  %v316_v18 = vld [vmem:[%s5801_s13 + $0x8] sm:$0xff]  ;;  %v5318_v19 = vld [vmem:[#allocation5 + $0x78] ss:$12 sps:$4 sm:$0xff]   ;;  %v5320_v22 = vld [vmem:[#allocation5 + $0x94] ss:$12 sps:$4 sm:$0xff]   ;;  %s5571_s26 = smov 96  }
  0x76   : > { %5172 = vmatpush3.bf16.msra.mxu1 %v5307_v7  ;;  %v323_v21 = vpack.c.bf16 %v316_v18, %v315_v17  ;;  %v5322_v23 = vld [vmem:[#allocation5 + $0x90] ss:$12 sps:$4 sm:$0xff]   ;;  %v5327_v24 = vld [vmem:[#allocation5 + $0x98] ss:$12 sps:$4 sm:$0xff]   ;;  %v5326_v26 = vld [vmem:[#allocation5 + $0xa8] ss:$12 sps:$4 sm:$0xff]  }
  0x77   : > { %5173 = vmatprep.subr.bf16.mxu1 %v5311_v10  ;;  %v5328_v27 = vld [vmem:[#allocation5 + $0xb0] ss:$12 sps:$4 sm:$0xff]   ;;  %v319_v30 = vld [vmem:[%s5801_s13 + $0x20] sm:$0xff]  ;;  %v320_v31 = vld [vmem:[%s5801_s13 + $0x28] sm:$0xff]  ;;  %v363_v39 = vsub.s32 0, %v5823_v38  ;;  %v371_v48 = vsub.s32 2, %v5823_v38 }
  0x78   : > { %509 = vmatpush1.bf16.msra.mxu0 %v5306_v8  ;;  %5185 = vmatprep.mubr.bf16.mxu1 %v323_v21  ;;  %v317_v28 = vld [vmem:[%s5801_s13 + $0x10] sm:$0xff]  ;;  %v325_v33 = vpack.c.bf16 %v320_v31, %v319_v30  ;;  %v322_v35 = vld [vmem:[%s5801_s13 + $0x38] sm:$0xff]  ;;  %v359_v40 = vld [vmem:[#allocation7] sm:$0x7]  ;;  %s5572_s28 = smov 64   ;;  %s5573_s30 = smov 32  }
  0x79   : > { %510 = vmatprep.subr.bf16.mxu0 %v5308_v9  ;;  %v324_v32 = vpack.c.bf16 %v318_v29, %v317_v28  ;;  %v321_v34 = vld [vmem:[%s5801_s13 + $0x30] sm:$0xff]  ;;  %v5826_v41 = vrot.slane %v359_v40, %v363_v39  ;;  %v5839_v53 = vrot.slane %v359_v40, %v371_v48  ;;  %v367_v60 = vsub.s32 1, %v5823_v38  ;;  %s6091_s29 = sshll.u32 %s5797_s17, 7  ;;  %s6883_s11 = sshll.u32 %s5553_s21, 11 }
  0x7a   : > { %5174 = vmatpush3.bf16.msra.mxu1 %v5311_v10  ;;  %v326_v36 = vpack.c.bf16 %v322_v35, %v321_v34  ;;  %v5574_v31 = vmov 1983009808   ;;  %vm1938_vm0 = vcmask 257024   ;;  %s6114_s7 = scalar_lea.vmem [#allocation8], %s6091_s29  ;;  %s6157_s10 = scalar_lea.vmem [#allocation11], %s6091_s29 }
  0x7b   : > { %5175 = vmatprep.subr.bf16.mxu1 %v5315_v12  ;;  %v368_v3 = vrot.slane %v359_v40, %v367_v60  ;;  %s6236_s16 = scalar_lea.vmem [#allocation9], %s6091_s29  ;;  %s4653_s15 = sshll.u32 %s6114_s7, 4  ;;  %s6894_s15 = int_to_ptr.vmem [resolvable:$true] %s4653_s15 }
  0x7c   : > { %511 = vmatpush1.bf16.msra.mxu0 %v5310_v11  ;;  %s6892_s8 = scalar_lea.hbm %s7182_s3, %s6883_s11  ;;  %p7199_p2 = scmp.ne.s32.totalorder %s7194_s6, 0 }
  0x7d   : > { %512 = vmatprep.subr.bf16.mxu0 %v5312_v13 }
  0x7e   : > { %5176 = vmatpush3.bf16.msra.mxu1 %v5315_v12 }
  0x7f   : > { %5177 = vmatprep.subr.bf16.mxu1 %v5319_v15 }
  0x80   : > { %513 = vmatpush1.bf16.msra.mxu0 %v5314_v14 }
  0x81   : > { %514 = vmatprep.subr.bf16.mxu0 %v5316_v16 }
  0x82   : > { %5178 = vmatpush3.bf16.msra.mxu1 %v5319_v15 }
  0x83   : > { %5179 = vmatprep.subr.bf16.mxu1 %v5323_v20 }
  0x84   : > { %515 = vmatpush1.bf16.msra.mxu0 %v5318_v19 }
  0x85   : > { %516 = vmatprep.subr.bf16.mxu0 %v5320_v22 }
  0x86   : > { %5180 = vmatpush3.bf16.msra.mxu1 %v5323_v20 }
  0x87   : > { %5181 = vmatprep.subr.bf16.mxu1 %v5327_v24 }
  0x88   : > { %517 = vmatpush1.bf16.msra.mxu0 %v5322_v23 }
  0x89   : > { %518 = vmatprep.subr.bf16.mxu0 %v5324_v25 }
  0x8a   : > { %5182 = vmatpush3.bf16.msra.mxu1 %v5327_v24 }
  0x8b   : > { %5183 = vmatprep.subr.bf16.mxu1 %v5328_v27 }
  0x8c   : > { %519 = vmatpush1.bf16.msra.mxu0 %v5326_v26 }
  0x8e   : > { %5184 = vmatpush3.bf16.msra.mxu1 %v5328_v27 }
  0x8f   : > { %537 = vmatmul.mubr.bf16.vlgmr.msra.gmra.mrb[0].mxu0 %v323_v21 }
  0x90   : > { %546 = vmatprep.mubr.bf16.mxu0 %v5570_v0 }
  0x91   : > { %5186 = vmatmul.mubr.bf16.vlgmr.msra.gmra.mrb[0].mxu1 %v324_v32 }
  0x92   : > { %5189 = vmatprep.mubr.bf16.mxu1 %v325_v33 }
  0x97   : > { %547 = vmatmul.mubr.bf16.gmra.mrb[4].mxu0 %v324_v32  ;;  %v725_v32 = vunpack.c.l.s4 %v5574_v31 }
  0x98   : > { %556 = vmatprep.mubr.bf16.mxu0 %v5570_v0 }
  0x99   : > { %5190 = vmatmul.mubr.bf16.gmra.mrb[4].mxu1 %v326_v36  ;;  %v726_v37 = vunpack.c.0.s8 %v725_v32 }
  0x9f   : > { %557 = vmatmul.mubr.bf16.gmra.mrb[8].mxu0 %v325_v33  ;;  %v5575_v33 = vmov 1934713408  }
  0xa0   : > { %566 = vmatprep.mubr.bf16.mxu0 %v5570_v0  ;;  %v757_v34 = vunpack.c.l.s4 %v5575_v33 }
  0xa2   : > { %v758_v39 = vunpack.c.0.s8 %v757_v34 }
  0xa7   : > { %567 = vmatmul.mubr.bf16.gmra.mrb[12].mxu0 %v326_v36 }
 0x162   : > { %v538_v42 = vpop.f32.mrb[0].mxu0 }
 0x163   : > { %v5829_v43 = vadd.f32 %v538_v42, %v5826_v41  ;;  %v540_v44 = vpop.f32.mrb[1].mxu0 }
 0x164   : > { %v542_v45 = vpop.f32.mrb[2].mxu0  ;;  %v5187_v49 = vpop.f32.mrb[0].mxu1  ;;  %v5888_v14 = vadd.f32 %v540_v44, %v368_v3 }
 0x165   : > { %v5832_v46 = vadd.f32 %v542_v45, %v5826_v41  ;;  %v544_v47 = vpop.f32.mrb[3].mxu0  ;;  %650 = vrot.lane.b32.xlu0 %v5829_v43, %s5571_s26  ;;  %v611_v50 = vpop.f32.mrb[1].mxu1  ;;  %v5856_v62 = vadd.f32 %v5187_v49, %v5839_v53  ;;  %v6031_v45 = vsub.s32 %v726_v37, %v5823_v38  ;;  %v6034_v49 = vsub.s32 %v758_v39, %v5823_v38 }
 0x166   : > { %v5188_v51 = vpop.f32.mrb[2].mxu1  ;;  %v5884_v12 = vadd.f32 %v544_v47, %v368_v3  ;;  %v5916_v23 = vadd.f32 %v611_v50, %v5839_v53 }
 0x167   : > { %676 = vrot.lane.b32.xlu1 %v5832_v46, %s5572_s28  ;;  %v614_v52 = vpop.f32.mrb[3].mxu1  ;;  %v5848_v57 = vadd.f32 %v5188_v51, %v5839_v53 }
 0x168   : > { %v5911_v22 = vadd.f32 %v614_v52, %v5839_v53 }
 0x169   : > { %674 = vrot.lane.b32.xlu0 %v5829_v43, %s5572_s28 }
 0x16a   : > { %v548_v54 = vpop.f32.mrb[4].mxu0 }
 0x16b   : > { %700 = vrot.lane.b32.xlu1 %v5832_v46, %s5573_s30  ;;  %v5845_v55 = vpop.f32.mrb[5].mxu0  ;;  %v5927_v24 = vadd.f32 %v548_v54, %v5826_v41 }
 0x16c   : > { %v552_v56 = vpop.f32.mrb[6].mxu0  ;;  %v5191_v59 = vpop.f32.mrb[4].mxu1  ;;  %v5963_v28 = vadd.f32 %v5845_v55, %v368_v3 }
 0x16d   : > { %698 = vrot.lane.b32.xlu0 %v5829_v43, %s5573_s30  ;;  %v5852_v58 = vpop.f32.mrb[7].mxu0  ;;  %v627_v61 = vpop.f32.mrb[5].mxu1  ;;  %v5936_v25 = vadd.f32 %v552_v56, %v5826_v41  ;;  %v5947_v26 = vadd.f32 %v5191_v59, %v5839_v53 }
 0x16e   : > { %v5861_v63 = vadd.f32 %v627_v61, %v5839_v53  ;;  %v5192_v0 = vpop.f32.mrb[6].mxu1  ;;  %v5968_v29 = vadd.f32 %v5852_v58, %v368_v3 }
 0x16f   : > { %3313 = vrot.lane.b32.xlu1 %v5848_v57, %s5571_s26  ;;  %v630_v1 = vpop.f32.mrb[7].mxu1  ;;  %v5954_v27 = vadd.f32 %v5192_v0, %v5839_v53 }
 0x170   : > { %v5866_v2 = vadd.f32 %v630_v1, %v5839_v53 }
 0x171   : > { %3311 = vrot.lane.b32.xlu0 %v5856_v62, %s5571_s26 }
 0x172   : > { %v558_v4 = vpop.f32.mrb[8].mxu0 }
 0x173   : > { %3337 = vrot.lane.b32.xlu1 %v5848_v57, %s5572_s28  ;;  %v5871_v5 = vadd.f32 %v558_v4, %v5826_v41  ;;  %v560_v6 = vpop.f32.mrb[9].mxu0 }
 0x174   : > { %v5873_v7 = vadd.f32 %v560_v6, %v368_v3  ;;  %v562_v8 = vpop.f32.mrb[10].mxu0 }
 0x175   : > { %3335 = vrot.lane.b32.xlu0 %v5856_v62, %s5572_s28  ;;  %v5878_v9 = vadd.f32 %v562_v8, %v5826_v41  ;;  %v564_v10 = vpop.f32.mrb[11].mxu0 }
 0x176   : > { %v5880_v11 = vadd.f32 %v564_v10, %v368_v3 }
 0x177   : > { %3361 = vrot.lane.b32.xlu1 %v5848_v57, %s5573_s30 }
 0x179   : > { %3359 = vrot.lane.b32.xlu0 %v5856_v62, %s5573_s30 }
 0x17a   : > { %v568_v13 = vpop.f32.mrb[12].mxu0 }
 0x17b   : > { %1981 = vrot.lane.b32.xlu1 %v5884_v12, %s5571_s26  ;;  %v5893_v15 = vadd.f32 %v568_v13, %v5826_v41  ;;  %v570_v16 = vpop.f32.mrb[13].mxu0 }
 0x17c   : > { %v5895_v17 = vadd.f32 %v570_v16, %v368_v3  ;;  %v572_v18 = vpop.f32.mrb[14].mxu0 }
 0x17d   : > { %1979 = vrot.lane.b32.xlu0 %v5888_v14, %s5571_s26  ;;  %v5900_v19 = vadd.f32 %v572_v18, %v5826_v41  ;;  %v574_v20 = vpop.f32.mrb[15].mxu0 }
 0x17e   : > { %v5902_v21 = vadd.f32 %v574_v20, %v368_v3 }
 0x17f   : > { %2005 = vrot.lane.b32.xlu1 %v5884_v12, %s5572_s28 }
 0x181   : > { %2003 = vrot.lane.b32.xlu0 %v5888_v14, %s5572_s28 }
 0x183   : > { %2029 = vrot.lane.b32.xlu1 %v5884_v12, %s5573_s30 }
 0x185   : > { %2027 = vrot.lane.b32.xlu0 %v5888_v14, %s5573_s30 }
 0x187   : > { %3309 = vrot.lane.b32.xlu1 %v5911_v22, %s5571_s26 }
 0x189   : > { %3307 = vrot.lane.b32.xlu0 %v5916_v23, %s5571_s26 }
 0x18b   : > { %3333 = vrot.lane.b32.xlu1 %v5911_v22, %s5572_s28 }
 0x18d   : > { %3331 = vrot.lane.b32.xlu0 %v5916_v23, %s5572_s28 }
 0x18f   : > { %3357 = vrot.lane.b32.xlu1 %v5911_v22, %s5573_s30 }
 0x191   : > { %3355 = vrot.lane.b32.xlu0 %v5916_v23, %s5573_s30 }
 0x193   : > { %654 = vrot.lane.b32.xlu1 %v5927_v24, %s5571_s26 }
 0x195   : > { %652 = vrot.lane.b32.xlu0 %v5832_v46, %s5571_s26 }
 0x197   : > { %656 = vrot.lane.b32.xlu1 %v5936_v25, %s5571_s26 }
 0x199   : > { %678 = vrot.lane.b32.xlu0 %v5927_v24, %s5572_s28 }
 0x19b   : > { %680 = vrot.lane.b32.xlu1 %v5936_v25, %s5572_s28 }
 0x19d   : > { %702 = vrot.lane.b32.xlu0 %v5927_v24, %s5573_s30 }
 0x19f   : > { %704 = vrot.lane.b32.xlu1 %v5936_v25, %s5573_s30 }
 0x1a1   : > { %3319 = vrot.lane.b32.xlu0 %v5947_v26, %s5571_s26 }
 0x1a3   : > { %3321 = vrot.lane.b32.xlu1 %v5954_v27, %s5571_s26 }
 0x1a5   : > { %3343 = vrot.lane.b32.xlu0 %v5947_v26, %s5572_s28 }
 0x1a7   : > { %3345 = vrot.lane.b32.xlu1 %v5954_v27, %s5572_s28 }
 0x1a9   : > { %1983 = vrot.lane.b32.xlu0 %v5963_v28, %s5571_s26 }
 0x1ab   : > { %1985 = vrot.lane.b32.xlu1 %v5968_v29, %s5571_s26 }
 0x1ad   : > { %2007 = vrot.lane.b32.xlu0 %v5963_v28, %s5572_s28 }
 0x1af   : > { %2009 = vrot.lane.b32.xlu1 %v5968_v29, %s5572_s28 }
 0x1b1   : > { %2031 = vrot.lane.b32.xlu0 %v5963_v28, %s5573_s30 }
 0x1b3   : > { %2033 = vrot.lane.b32.xlu1 %v5968_v29, %s5573_s30 }
 0x1b5   : > { %3315 = vrot.lane.b32.xlu0 %v5861_v63, %s5571_s26 }
 0x1b7   : > { %3317 = vrot.lane.b32.xlu1 %v5866_v2, %s5571_s26 }
 0x1b9   : > { %3339 = vrot.lane.b32.xlu0 %v5861_v63, %s5572_s28 }
 0x1bb   : > { %3341 = vrot.lane.b32.xlu1 %v5866_v2, %s5572_s28 }
 0x1bd   : > { %3363 = vrot.lane.b32.xlu0 %v5861_v63, %s5573_s30 }
 0x1bf   : > { %3365 = vrot.lane.b32.xlu1 %v5866_v2, %s5573_s30 }
 0x1c1   : > { %658 = vrot.lane.b32.xlu0 %v5871_v5, %s5571_s26 }
 0x1c3   : > { %660 = vrot.lane.b32.xlu1 %v5878_v9, %s5571_s26 }
 0x1c5   : > { %682 = vrot.lane.b32.xlu0 %v5871_v5, %s5572_s28 }
 0x1c7   : > { %684 = vrot.lane.b32.xlu1 %v5878_v9, %s5572_s28 }
 0x1c9   : > { %706 = vrot.lane.b32.xlu0 %v5871_v5, %s5573_s30 }
 0x1cb   : > { %708 = vrot.lane.b32.xlu1 %v5878_v9, %s5573_s30 }
 0x1cd   : > { %1987 = vrot.lane.b32.xlu0 %v5873_v7, %s5571_s26 }
 0x1cf   : > { %1989 = vrot.lane.b32.xlu1 %v5880_v11, %s5571_s26 }
 0x1d1   : > { %2011 = vrot.lane.b32.xlu0 %v5873_v7, %s5572_s28 }
 0x1d3   : > { %2013 = vrot.lane.b32.xlu1 %v5880_v11, %s5572_s28 }
 0x1d5   : > { %2035 = vrot.lane.b32.xlu0 %v5873_v7, %s5573_s30 }
 0x1d7   : > { %2037 = vrot.lane.b32.xlu1 %v5880_v11, %s5573_s30  ;;  %v651_v30 = vpop.permute.xlu0 %650 }
 0x1d9   : > { %v677_v35 = vpop.permute.xlu1 %676  ;;  %662 = vrot.lane.b32.xlu0 %v5893_v15, %s5571_s26 }
 0x1da   : > { %v790_v54 = vcombine.low %v5832_v46, %v677_v35  ;;  %v791_v55 = vcombine.high %v5832_v46, %v677_v35 }
 0x1db   : > { %664 = vrot.lane.b32.xlu1 %v5900_v19, %s5571_s26  ;;  %v675_v36 = vpop.permute.xlu0 %674 }
 0x1dc   : > { %v722_v41 = vcombine.low %v5829_v43, %v675_v36  ;;  %v723_v42 = vcombine.high %v5829_v43, %v675_v36  ;;  %v6055_v4 = vrot.slane %v790_v54, %v6031_v45  ;;  %v6058_v6 = vrot.slane %v791_v55, %v6031_v45 }
 0x1dd   : > { %v6022_v40 = vpop.permute.xlu1 %700  ;;  %686 = vrot.lane.b32.xlu0 %v5893_v15, %s5572_s28 }
 0x1de   : > { %v730_v51 = vrot.slane %v722_v41, %v6031_v45  ;;  %v737_v43 = vrot.slane %v723_v42, %v6031_v45 }
 0x1df   : > { %688 = vrot.lane.b32.xlu1 %v5900_v19, %s5572_s28  ;;  %v699_v44 = vpop.permute.xlu0 %698 }
 0x1e0   : > { %v738_v47 = vcombine.low %v651_v30, %v699_v44  ;;  %v739_v48 = vcombine.high %v651_v30, %v699_v44 }
 0x1e1   : > { %v3314_v50 = vpop.permute.xlu1 %3313  ;;  %710 = vrot.lane.b32.xlu0 %v5893_v15, %s5573_s30 }
 0x1e2   : > { %v746_v52 = vrot.slane %v738_v47, %v6031_v45  ;;  %v753_v53 = vrot.slane %v739_v48, %v6031_v45 }
 0x1e3   : > { %712 = vrot.lane.b32.xlu1 %v5900_v19, %s5573_s30  ;;  %v6046_v38 = vpop.permute.xlu0 %3311 }
 0x1e4   : > { %v754_v56 = vcombine.low %v730_v51, %v746_v52  ;;  %v755_v58 = vcombine.high %v730_v51, %v746_v52  ;;  %v770_v59 = vcombine.low %v737_v43, %v753_v53  ;;  %v771_v60 = vcombine.high %v737_v43, %v753_v53 }
 0x1e5   : > { %v3338_v61 = vpop.permute.xlu1 %3337  ;;  %1991 = vrot.lane.b32.xlu0 %v5895_v17, %s5571_s26 }
 0x1e6   : > { %v762_v0 = vrot.slane %v754_v56, %v6034_v49  ;;  %v769_v1 = vrot.slane %v755_v58, %v6034_v49  ;;  %v778_v3 = vrot.slane %v770_v59, %v6034_v49  ;;  %v785_v46 = vrot.slane %v771_v60, %v6034_v49 }
 0x1e7   : > { %v3583_v8 = vcombine.low %v5848_v57, %v3338_v61  ;;  %v3584_v10 = vcombine.high %v5848_v57, %v3338_v61  ;;  %1993 = vrot.lane.b32.xlu1 %v5902_v21, %s5571_s26  ;;  %v3336_v13 = vpop.permute.xlu0 %3335  ;;  %s5415_s26 = scalar_lea.vmem %s6894_s15, 2048 }
 0x1e8   : > { %v1266_v16 = vcombine.low %v762_v0, %v769_v1  ;;  %v4902_v18 = vcombine.high %v762_v0, %v769_v1  ;;  %v1282_v20 = vcombine.low %v778_v3, %v785_v46  ;;  %v4903_v30 = vcombine.high %v778_v3, %v785_v46  ;;  %p5416_p11 = scmp.ne.s32.totalorder %s6894_s15, %s5415_s26 }
 0x1e9   : > { %v3591_v31 = vrot.slane %v3583_v8, %v6031_v45  ;;  %v3598_v32 = vrot.slane %v3584_v10, %v6031_v45  ;;  %v3515_v33 = vcombine.low %v5856_v62, %v3336_v13  ;;  %v3516_v34 = vcombine.high %v5856_v62, %v3336_v13  ;;  %v3362_v35 = vpop.permute.xlu1 %3361  ;;  %2015 = vrot.lane.b32.xlu0 %v5895_v17, %s5572_s28 }
 0x1ea   : > { %v1273_v57 = vrot.slane %v1266_v16, %v6031_v45  ;;  %v1281_v36 = vrot.slane %v4902_v18, %v6031_v45  ;;  %v1289_v37 = vrot.slane %v1282_v20, %v6031_v45  ;;  %v1297_v39 = vrot.slane %v4903_v30, %v6031_v45  ;;  %p5417_p13 = pnand %p5416_p11, %p7199_p2 }
 0x1eb   : > { %v6075_v41 = vrot.slane %v3515_v33, %v6031_v45  ;;  %v6078_v42 = vrot.slane %v3516_v34, %v6031_v45  ;;  %v3599_v62 = vcombine.low %v3314_v50, %v3362_v35  ;;  %v3600_v44 = vcombine.high %v3314_v50, %v3362_v35  ;;  %2017 = vrot.lane.b32.xlu1 %v5902_v21, %s5572_s28  ;;  %v3360_v47 = vpop.permute.xlu0 %3359 }
 0x1ec   : > { %v1298_v48 = vcombine.low %v1273_v57, %v1281_v36  ;;  %v1299_v51 = vcombine.high %v1273_v57, %v1281_v36  ;;  %v1314_v43 = vcombine.low %v1289_v37, %v1297_v39  ;;  %v1315_v52 = vcombine.high %v1289_v37, %v1297_v39  ;;  %p5418_p5 = pneg %p5417_p13 }
 0x1ed   : > { %v3607_v53 = vrot.slane %v3599_v62, %v6031_v45  ;;  %v3614_v54 = vrot.slane %v3600_v44, %v6031_v45  ;;  %v3531_v55 = vcombine.low %v6046_v38, %v3360_v47  ;;  %v3532_v56 = vcombine.high %v6046_v38, %v3360_v47  ;;  %v6086_v58 = vpop.permute.xlu1 %1981  ;;  %2039 = vrot.lane.b32.xlu0 %v5895_v17, %s5573_s30 }
 0x1ee   : > { %v1306_v50 = vrot.slane %v1298_v48, %v6034_v49  ;;  %v1313_v59 = vrot.slane %v1299_v51, %v6034_v49  ;;  %v1322_v60 = vrot.slane %v1314_v43, %v6034_v49  ;;  %v1329_v61 = vrot.slane %v1315_v52, %v6034_v49 }
 0x1ef   : > { %v3615_v0 = vcombine.low %v3591_v31, %v3607_v53  ;;  %v3616_v1 = vcombine.high %v3591_v31, %v3607_v53  ;;  %v3631_v3 = vcombine.low %v3598_v32, %v3614_v54  ;;  %v3632_v46 = vcombine.high %v3598_v32, %v3614_v54  ;;  %2041 = vrot.lane.b32.xlu1 %v5902_v21, %s5573_s30  ;;  %v6099_v38 = vpop.permute.xlu0 %1979 }
 0x1f0   : > { %v1330_v8 = vcombine.low %v1306_v50, %v1322_v60  ;;  %v1331_v10 = vcombine.high %v1306_v50, %v1322_v60  ;;  %v1332_v13 = vcombine.low %v1313_v59, %v1329_v61  ;;  %v1333_v16 = vcombine.high %v1313_v59, %v1329_v61 }
 0x1f1   : > { %v3623_v18 = vrot.slane %v3615_v0, %v6034_v49  ;;  %v3630_v20 = vrot.slane %v3616_v1, %v6034_v49  ;;  %v3639_v30 = vrot.slane %v3631_v3, %v6034_v49  ;;  %v3646_v31 = vrot.slane %v3632_v46, %v6034_v49  ;;  %v6105_v33 = vpop.permute.xlu1 %2005  ;;  %3367 = vrot.lane.b32.xlu0 %v5947_v26, %s5573_s30 }
 0x1f2   : > { %v5058_v32 = vpack.c.bf16 %v1330_v8, %v1330_v8  ;;  %v5066_v34 = vpack.c.bf16 %v1331_v10, %v1331_v10  ;;  %v5074_v35 = vpack.c.bf16 %v1332_v13, %v1332_v13  ;;  %v5082_v57 = vpack.c.bf16 %v1333_v16, %v1333_v16 }
 0x1f3   : > { %v4127_v36 = vcombine.low %v3623_v18, %v3630_v20  ;;  %v5004_v37 = vcombine.high %v3623_v18, %v3630_v20  ;;  %v4143_v39 = vcombine.low %v3639_v30, %v3646_v31  ;;  %v5005_v62 = vcombine.high %v3639_v30, %v3646_v31  ;;  %3369 = vrot.lane.b32.xlu1 %v5954_v27, %s5573_s30  ;;  %v6111_v44 = vpop.permute.xlu0 %2003  ;;  %s5576_s30 = smov [#allocation8]  }
 0x1f4   : > { %1939 = vst.msk [vmem:[%s6114_s7] sm:$0xf] %vm1938_vm0, %v5058_v32  ;;  %1947 = vst.msk [vmem:[%s6114_s7 + $0x20] sm:$0xf] %vm1938_vm0, %v5066_v34  ;;  %v3539_v47 = vrot.slane %v3531_v55, %v6031_v45  ;;  %v3546_v48 = vrot.slane %v3532_v56, %v6031_v45  ;;  %v2119_v51 = vcombine.low %v5884_v12, %v6105_v33  ;;  %s5419_s29 = sshll.u32 %s5576_s30, 4  ;;  %s5420_s29 = int_to_ptr.vmem [resolvable:$false] %s5419_s29 }
 0x1f5   : > { %1955 = vst.msk [vmem:[%s6114_s7 + $0x40] sm:$0xf] %vm1938_vm0, %v5074_v35  ;;  %1963 = vst.msk [vmem:[%s6114_s7 + $0x60] sm:$0xf] %vm1938_vm0, %v5082_v57  ;;  %v2120_v43 = vcombine.high %v5884_v12, %v6105_v33  ;;  %v4134_v52 = vrot.slane %v4127_v36, %v6031_v45  ;;  %v4142_v53 = vrot.slane %v5004_v37, %v6031_v45  ;;  %v2030_v3 = vpop.permute.xlu1 %2029  ;;  %p5422_p7 = scmp.lt.s32.totalorder %s6894_s15, %s5420_s29 }
 0x1f6   : > { %v4150_v54 = vrot.slane %v4143_v39, %v6031_v45  ;;  %v4158_v50 = vrot.slane %v5005_v62, %v6031_v45  ;;  %v3547_v59 = vcombine.low %v6075_v41, %v3539_v47  ;;  %v3548_v55 = vcombine.high %v6075_v41, %v3539_v47 }
 0x1f7   : > { %v3563_v56 = vcombine.low %v6078_v42, %v3546_v48  ;;  %v3564_v60 = vcombine.high %v6078_v42, %v3546_v48  ;;  %v4159_v61 = vcombine.low %v4134_v52, %v4142_v53  ;;  %v4160_v0 = vcombine.high %v4134_v52, %v4142_v53  ;;  %v6142_v16 = vpop.permute.xlu0 %2027 }
 0x1f8   : > { %v4175_v1 = vcombine.low %v4150_v54, %v4158_v50  ;;  %v4176_v12 = vcombine.high %v4150_v54, %v4158_v50  ;;  %v3555_v46 = vrot.slane %v3547_v59, %v6034_v49  ;;  %v3562_v8 = vrot.slane %v3548_v55, %v6034_v49 }
 0x1f9   : > { %v3571_v10 = vrot.slane %v3563_v56, %v6034_v49  ;;  %v3578_v13 = vrot.slane %v3564_v60, %v6034_v49  ;;  %v4167_v41 = vrot.slane %v4159_v61, %v6034_v49  ;;  %v4174_v18 = vrot.slane %v4160_v0, %v6034_v49  ;;  %v6152_v50 = vpop.permute.xlu1 %3309 }
 0x1fa   : > { %v4183_v42 = vrot.slane %v4175_v1, %v6034_v49  ;;  %v4190_v20 = vrot.slane %v4176_v12, %v6034_v49  ;;  %v4059_v30 = vcombine.low %v3555_v46, %v3562_v8  ;;  %v5002_v31 = vcombine.high %v3555_v46, %v3562_v8 }
 0x1fb   : > { %v4075_v33 = vcombine.low %v3571_v10, %v3578_v13  ;;  %v5003_v32 = vcombine.high %v3571_v10, %v3578_v13  ;;  %v6154_v61 = vpop.permute.xlu0 %3307  ;;  %v2127_v0 = vrot.slane %v2119_v51, %v6031_v45  ;;  %v2134_v1 = vrot.slane %v2120_v43, %v6031_v45 }
 0x1fc   : > { %v4191_v34 = vcombine.low %v4167_v41, %v4183_v42  ;;  %v4192_v35 = vcombine.high %v4167_v41, %v4183_v42  ;;  %v4193_v57 = vcombine.low %v4174_v18, %v4190_v20  ;;  %v4194_v36 = vcombine.high %v4174_v18, %v4190_v20 }
 0x1fd   : > { %v4066_v37 = vrot.slane %v4059_v30, %v6031_v45  ;;  %v4074_v39 = vrot.slane %v5002_v31, %v6031_v45  ;;  %v4082_v62 = vrot.slane %v4075_v33, %v6031_v45  ;;  %v4090_v47 = vrot.slane %v5003_v32, %v6031_v45 }
 0x1fe   : > { %v5125_v48 = vpack.c.bf16 %v4191_v34, %v4191_v34  ;;  %v5133_v52 = vpack.c.bf16 %v4192_v35, %v4192_v35  ;;  %v5141_v53 = vpack.c.bf16 %v4193_v57, %v4193_v57  ;;  %v5149_v54 = vpack.c.bf16 %v4194_v36, %v4194_v36  ;;  %v6187_v35 = vpop.permute.xlu1 %3333 }
 0x1ff   : > { %v4091_v59 = vcombine.low %v4066_v37, %v4074_v39  ;;  %v4092_v55 = vcombine.high %v4066_v37, %v4074_v39  ;;  %v4107_v56 = vcombine.low %v4082_v62, %v4090_v47  ;;  %v4108_v60 = vcombine.high %v4082_v62, %v4090_v47  ;;  %v6189_v37 = vpop.permute.xlu0 %3331 }
 0x200   : > { %4598 = vst.msk [vmem:[%s6157_s10 + $0xc] sm:$0xf] %vm1938_vm0, %v5125_v48  ;;  %4606 = vst.msk [vmem:[%s6157_s10 + $0x2c] sm:$0xf] %vm1938_vm0, %v5133_v52  ;;  %v2051_v12 = vcombine.low %v5888_v14, %v6111_v44  ;;  %v2052_v46 = vcombine.high %v5888_v14, %v6111_v44  ;;  %v2135_v43 = vcombine.low %v6086_v58, %v2030_v3 }
 0x201   : > { %4614 = vst.msk [vmem:[%s6157_s10 + $0x4c] sm:$0xf] %vm1938_vm0, %v5141_v53  ;;  %4622 = vst.msk [vmem:[%s6157_s10 + $0x6c] sm:$0xf] %vm1938_vm0, %v5149_v54  ;;  %v4099_v8 = vrot.slane %v4091_v59, %v6034_v49  ;;  %v4106_v10 = vrot.slane %v4092_v55, %v6034_v49  ;;  %v4115_v13 = vrot.slane %v4107_v56, %v6034_v49 }
 0x202   : > { %v4122_v41 = vrot.slane %v4108_v60, %v6034_v49  ;;  %v2059_v18 = vrot.slane %v2051_v12, %v6031_v45  ;;  %v2066_v51 = vrot.slane %v2052_v46, %v6031_v45  ;;  %v2136_v42 = vcombine.high %v6086_v58, %v2030_v3 }
 0x203   : > { %v4123_v20 = vcombine.low %v4099_v8, %v4115_v13  ;;  %v4124_v30 = vcombine.high %v4099_v8, %v4115_v13  ;;  %v2143_v44 = vrot.slane %v2135_v43, %v6031_v45  ;;  %v2067_v32 = vcombine.low %v6099_v38, %v6142_v16 }
 0x204   : > { %v4125_v31 = vcombine.low %v4106_v10, %v4122_v41  ;;  %v4126_v14 = vcombine.high %v4106_v10, %v4122_v41  ;;  %v2150_v33 = vrot.slane %v2136_v42, %v6031_v45  ;;  %v2068_v34 = vcombine.high %v6099_v38, %v6142_v16  ;;  %v6209_v41 = vpop.permute.xlu1 %3357 }
 0x205   : > { %v5124_v58 = vpack.c.bf16 %v4123_v20, %v4123_v20  ;;  %v5132_v3 = vpack.c.bf16 %v4124_v30, %v4124_v30  ;;  %v2151_v39 = vcombine.low %v2127_v0, %v2143_v44  ;;  %v2152_v62 = vcombine.high %v2127_v0, %v2143_v44 }
 0x206   : > { %v5140_v57 = vpack.c.bf16 %v4125_v31, %v4125_v31  ;;  %v5148_v36 = vpack.c.bf16 %v4126_v14, %v4126_v14  ;;  %v2167_v47 = vcombine.low %v2134_v1, %v2150_v33  ;;  %v2168_v48 = vcombine.high %v2134_v1, %v2150_v33  ;;  %v6215_v31 = vpop.permute.xlu0 %3355 }
 0x207   : > { %4597 = vst.msk [vmem:[%s6157_s10 + $0x8] sm:$0xf] %vm1938_vm0, %v5124_v58  ;;  %4605 = vst.msk [vmem:[%s6157_s10 + $0x28] sm:$0xf] %vm1938_vm0, %v5132_v3  ;;  %v2075_v38 = vrot.slane %v2067_v32, %v6031_v45  ;;  %v2082_v16 = vrot.slane %v2068_v34, %v6031_v45  ;;  %v3447_v52 = vcombine.low %v5911_v22, %v6187_v35 }
 0x208   : > { %4613 = vst.msk [vmem:[%s6157_s10 + $0x48] sm:$0xf] %vm1938_vm0, %v5140_v57  ;;  %4621 = vst.msk [vmem:[%s6157_s10 + $0x68] sm:$0xf] %vm1938_vm0, %v5148_v36  ;;  %v3448_v53 = vcombine.high %v5911_v22, %v6187_v35  ;;  %v2159_v54 = vrot.slane %v2151_v39, %v6034_v49  ;;  %v2166_v59 = vrot.slane %v2152_v62, %v6034_v49 }
 0x209   : > { %v2175_v55 = vrot.slane %v2167_v47, %v6034_v49  ;;  %v2182_v56 = vrot.slane %v2168_v48, %v6034_v49  ;;  %v2083_v60 = vcombine.low %v2059_v18, %v2075_v38  ;;  %v2084_v0 = vcombine.high %v2059_v18, %v2075_v38 }
 0x20a   : > { %v2099_v1 = vcombine.low %v2066_v51, %v2082_v16  ;;  %v2100_v12 = vcombine.high %v2066_v51, %v2082_v16  ;;  %v2663_v46 = vcombine.low %v2159_v54, %v2166_v59  ;;  %v4952_v8 = vcombine.high %v2159_v54, %v2166_v59 }
 0x20b   : > { %v2679_v10 = vcombine.low %v2175_v55, %v2182_v56  ;;  %v4953_v13 = vcombine.high %v2175_v55, %v2182_v56  ;;  %v2091_v43 = vrot.slane %v2083_v60, %v6034_v49  ;;  %v2098_v42 = vrot.slane %v2084_v0, %v6034_v49  ;;  %v6229_v56 = vpop.permute.xlu1 %654 }
 0x20c   : > { %v2107_v20 = vrot.slane %v2099_v1, %v6034_v49  ;;  %v2114_v30 = vrot.slane %v2100_v12, %v6034_v49  ;;  %v2670_v18 = vrot.slane %v2663_v46, %v6031_v45  ;;  %v2678_v51 = vrot.slane %v4952_v8, %v6031_v45  ;;  %v653_v46 = vpop.permute.xlu0 %652 }
 0x20d   : > { %v2686_v14 = vrot.slane %v2679_v10, %v6031_v45  ;;  %v2694_v44 = vrot.slane %v4953_v13, %v6031_v45  ;;  %v2595_v33 = vcombine.low %v2091_v43, %v2098_v42  ;;  %v4950_v32 = vcombine.high %v2091_v43, %v2098_v42 }
 0x20e   : > { %v2611_v34 = vcombine.low %v2107_v20, %v2114_v30  ;;  %v4951_v58 = vcombine.high %v2107_v20, %v2114_v30  ;;  %v2695_v3 = vcombine.low %v2670_v18, %v2678_v51  ;;  %v2696_v57 = vcombine.high %v2670_v18, %v2678_v51 }
 0x20f   : > { %v2711_v36 = vcombine.low %v2686_v14, %v2694_v44  ;;  %v2712_v39 = vcombine.high %v2686_v14, %v2694_v44  ;;  %v2602_v62 = vrot.slane %v2595_v33, %v6031_v45  ;;  %v2610_v47 = vrot.slane %v4950_v32, %v6031_v45 }
 0x210   : > { %v2618_v48 = vrot.slane %v2611_v34, %v6031_v45  ;;  %v2626_v38 = vrot.slane %v4951_v58, %v6031_v45  ;;  %v2703_v16 = vrot.slane %v2695_v3, %v6034_v49  ;;  %v2710_v54 = vrot.slane %v2696_v57, %v6034_v49 }
 0x211   : > { %v2719_v59 = vrot.slane %v2711_v36, %v6034_v49  ;;  %v2726_v55 = vrot.slane %v2712_v39, %v6034_v49  ;;  %v2627_v60 = vcombine.low %v2602_v62, %v2610_v47  ;;  %v2628_v0 = vcombine.high %v2602_v62, %v2610_v47  ;;  %v6258_v47 = vpop.permute.xlu1 %656 }
 0x212   : > { %v2643_v1 = vcombine.low %v2618_v48, %v2626_v38  ;;  %v2644_v12 = vcombine.high %v2618_v48, %v2626_v38  ;;  %v3455_v57 = vrot.slane %v3447_v52, %v6031_v45  ;;  %v3462_v36 = vrot.slane %v3448_v53, %v6031_v45  ;;  %v6260_v52 = vpop.permute.xlu0 %678 }
 0x213   : > { %v2727_v8 = vcombine.low %v2703_v16, %v2719_v59  ;;  %v2728_v10 = vcombine.high %v2703_v16, %v2719_v59  ;;  %v2729_v13 = vcombine.low %v2710_v54, %v2726_v55  ;;  %v2730_v43 = vcombine.high %v2710_v54, %v2726_v55 }
 0x214   : > { %v2635_v42 = vrot.slane %v2627_v60, %v6034_v49  ;;  %v2642_v20 = vrot.slane %v2628_v0, %v6034_v49  ;;  %v2651_v30 = vrot.slane %v2643_v1, %v6034_v49  ;;  %v2658_v18 = vrot.slane %v2644_v12, %v6034_v49 }
 0x215   : > { %v5091_v51 = vpack.c.bf16 %v2727_v8, %v2727_v8  ;;  %v5099_v14 = vpack.c.bf16 %v2728_v10, %v2728_v10  ;;  %v5107_v44 = vpack.c.bf16 %v2729_v13, %v2729_v13  ;;  %v5115_v33 = vpack.c.bf16 %v2730_v43, %v2730_v43  ;;  %v6296_v43 = vpop.permute.xlu1 %680 }
 0x216   : > { %v2659_v32 = vcombine.low %v2635_v42, %v2651_v30  ;;  %v2660_v34 = vcombine.high %v2635_v42, %v2651_v30  ;;  %v2661_v58 = vcombine.low %v2642_v20, %v2658_v18  ;;  %v2662_v3 = vcombine.high %v2642_v20, %v2658_v18 }
 0x217   : > { %3268 = vst.msk [vmem:[%s6236_s16 + $0x4] sm:$0xf] %vm1938_vm0, %v5091_v51  ;;  %3276 = vst.msk [vmem:[%s6236_s16 + $0x24] sm:$0xf] %vm1938_vm0, %v5099_v14  ;;  %v3379_v39 = vcombine.low %v5916_v23, %v6189_v37  ;;  %v3380_v62 = vcombine.high %v5916_v23, %v6189_v37  ;;  %v3463_v35 = vcombine.low %v6152_v50, %v6209_v41 }
 0x218   : > { %3284 = vst.msk [vmem:[%s6236_s16 + $0x44] sm:$0xf] %vm1938_vm0, %v5107_v44  ;;  %3292 = vst.msk [vmem:[%s6236_s16 + $0x64] sm:$0xf] %vm1938_vm0, %v5115_v33  ;;  %v5090_v48 = vpack.c.bf16 %v2659_v32, %v2659_v32  ;;  %v5098_v38 = vpack.c.bf16 %v2660_v34, %v2660_v34  ;;  %v5106_v16 = vpack.c.bf16 %v2661_v58, %v2661_v58 }
 0x219   : > { %v5114_v54 = vpack.c.bf16 %v2662_v3, %v2662_v3  ;;  %v3387_v59 = vrot.slane %v3379_v39, %v6031_v45  ;;  %v3394_v22 = vrot.slane %v3380_v62, %v6031_v45  ;;  %v3464_v53 = vcombine.high %v6152_v50, %v6209_v41 }
 0x21a   : > { %3267 = vst.msk [vmem:[%s6236_s16] sm:$0xf] %vm1938_vm0, %v5090_v48  ;;  %3275 = vst.msk [vmem:[%s6236_s16 + $0x20] sm:$0xf] %vm1938_vm0, %v5098_v38  ;;  %v3395_v23 = vcombine.low %v6154_v61, %v6215_v31  ;;  %v3396_v37 = vcombine.high %v6154_v61, %v6215_v31  ;;  %v806_v55 = vcombine.low %v653_v46, %v6022_v40 }
 0x21b   : > { %3283 = vst.msk [vmem:[%s6236_s16 + $0x40] sm:$0xf] %vm1938_vm0, %v5106_v16  ;;  %3291 = vst.msk [vmem:[%s6236_s16 + $0x60] sm:$0xf] %vm1938_vm0, %v5114_v54  ;;  %v807_v60 = vcombine.high %v653_v46, %v6022_v40  ;;  %v3471_v50 = vrot.slane %v3463_v35, %v6031_v45  ;;  %v3478_v41 = vrot.slane %v3464_v53, %v6031_v45 }
 0x21c   : > { %v858_v0 = vcombine.low %v5927_v24, %v6260_v52  ;;  %v859_v1 = vcombine.high %v5927_v24, %v6260_v52  ;;  %v3403_v12 = vrot.slane %v3395_v23, %v6031_v45  ;;  %v3410_v8 = vrot.slane %v3396_v37, %v6031_v45  ;;  %v6312_v37 = vpop.permute.xlu1 %704 }
 0x21d   : > { %v6291_v61 = vrot.slane %v806_v55, %v6031_v45  ;;  %v6294_v31 = vrot.slane %v807_v60, %v6031_v45  ;;  %v3479_v40 = vcombine.low %v3455_v57, %v3471_v50  ;;  %v3480_v46 = vcombine.high %v3455_v57, %v3471_v50 }
 0x21e   : > { %v3495_v10 = vcombine.low %v3462_v36, %v3478_v41  ;;  %v3496_v13 = vcombine.high %v3462_v36, %v3478_v41  ;;  %v3411_v42 = vcombine.low %v3387_v59, %v3403_v12  ;;  %v3412_v20 = vcombine.high %v3387_v59, %v3403_v12  ;;  %v6306_v59 = vpop.permute.xlu0 %702 }
 0x21f   : > { %v3427_v30 = vcombine.low %v3394_v22, %v3410_v8  ;;  %v3428_v18 = vcombine.high %v3394_v22, %v3410_v8  ;;  %v3487_v51 = vrot.slane %v3479_v40, %v6034_v49  ;;  %v3494_v14 = vrot.slane %v3480_v46, %v6034_v49 }
 0x220   : > { %v3503_v44 = vrot.slane %v3495_v10, %v6034_v49  ;;  %v3510_v33 = vrot.slane %v3496_v13, %v6034_v49  ;;  %v3419_v32 = vrot.slane %v3411_v42, %v6034_v49  ;;  %v3426_v34 = vrot.slane %v3412_v20, %v6034_v49 }
 0x221   : > { %v3435_v58 = vrot.slane %v3427_v30, %v6034_v49  ;;  %v3442_v3 = vrot.slane %v3428_v18, %v6034_v49  ;;  %v3991_v57 = vcombine.low %v3487_v51, %v3494_v14  ;;  %v5000_v36 = vcombine.high %v3487_v51, %v3494_v14 }
 0x222   : > { %v4007_v39 = vcombine.low %v3503_v44, %v3510_v33  ;;  %v5001_v62 = vcombine.high %v3503_v44, %v3510_v33  ;;  %v3923_v48 = vcombine.low %v3419_v32, %v3426_v34  ;;  %v4998_v38 = vcombine.high %v3419_v32, %v3426_v34 }
 0x223   : > { %v3939_v16 = vcombine.low %v3435_v58, %v3442_v3  ;;  %v4999_v54 = vcombine.high %v3435_v58, %v3442_v3  ;;  %v3998_v22 = vrot.slane %v3991_v57, %v6031_v45  ;;  %v4006_v35 = vrot.slane %v5000_v36, %v6031_v45  ;;  %v6326_v58 = vpop.permute.xlu0 %3319 }
 0x224   : > { %v4014_v53 = vrot.slane %v4007_v39, %v6031_v45  ;;  %v4022_v23 = vrot.slane %v5001_v62, %v6031_v45  ;;  %v3930_v55 = vrot.slane %v3923_v48, %v6031_v45  ;;  %v3938_v60 = vrot.slane %v4998_v38, %v6031_v45  ;;  %v6328_v62 = vpop.permute.xlu1 %3321 }
 0x225   : > { %v3946_v50 = vrot.slane %v3939_v16, %v6031_v45  ;;  %v3954_v41 = vrot.slane %v4999_v54, %v6031_v45  ;;  %v4023_v12 = vcombine.low %v3998_v22, %v4006_v35  ;;  %v4024_v8 = vcombine.high %v3998_v22, %v4006_v35 }
 0x226   : > { %v4039_v40 = vcombine.low %v4014_v53, %v4022_v23  ;;  %v4040_v46 = vcombine.high %v4014_v53, %v4022_v23  ;;  %v3955_v10 = vcombine.low %v3930_v55, %v3938_v60  ;;  %v3956_v13 = vcombine.high %v3930_v55, %v3938_v60 }
 0x227   : > { %v3971_v42 = vcombine.low %v3946_v50, %v3954_v41  ;;  %v3972_v20 = vcombine.high %v3946_v50, %v3954_v41  ;;  %v4031_v30 = vrot.slane %v4023_v12, %v6034_v49  ;;  %v4038_v18 = vrot.slane %v4024_v8, %v6034_v49 }
 0x228   : > { %v4047_v51 = vrot.slane %v4039_v40, %v6034_v49  ;;  %v4054_v14 = vrot.slane %v4040_v46, %v6034_v49  ;;  %v3963_v44 = vrot.slane %v3955_v10, %v6034_v49  ;;  %v3970_v33 = vrot.slane %v3956_v13, %v6034_v49 }
 0x229   : > { %v3979_v32 = vrot.slane %v3971_v42, %v6034_v49  ;;  %v3986_v34 = vrot.slane %v3972_v20, %v6034_v49  ;;  %v822_v12 = vcombine.low %v6055_v4, %v6291_v61  ;;  %v823_v8 = vcombine.high %v6055_v4, %v6291_v61 }
 0x22a   : > { %v4055_v3 = vcombine.low %v4031_v30, %v4047_v51  ;;  %v4056_v57 = vcombine.high %v4031_v30, %v4047_v51  ;;  %v4057_v36 = vcombine.low %v4038_v18, %v4054_v14  ;;  %v4058_v39 = vcombine.high %v4038_v18, %v4054_v14  ;;  %v6372_v30 = vpop.permute.xlu1 %3345 }
 0x22b   : > { %v3987_v48 = vcombine.low %v3963_v44, %v3979_v32  ;;  %v3988_v38 = vcombine.high %v3963_v44, %v3979_v32  ;;  %v3989_v16 = vcombine.low %v3970_v33, %v3986_v34  ;;  %v3990_v54 = vcombine.high %v3970_v33, %v3986_v34 }
 0x22c   : > { %v5123_v22 = vpack.c.bf16 %v4055_v3, %v4055_v3  ;;  %v5131_v35 = vpack.c.bf16 %v4056_v57, %v4056_v57  ;;  %v5139_v53 = vpack.c.bf16 %v4057_v36, %v4057_v36  ;;  %v5147_v23 = vpack.c.bf16 %v4058_v39, %v4058_v39 }
 0x22d   : > { %v5122_v55 = vpack.c.bf16 %v3987_v48, %v3987_v48  ;;  %v5130_v60 = vpack.c.bf16 %v3988_v38, %v3988_v38  ;;  %v5138_v50 = vpack.c.bf16 %v3989_v16, %v3989_v16  ;;  %v5146_v41 = vpack.c.bf16 %v3990_v54, %v3990_v54 }
 0x22e   : > { %4596 = vst.msk [vmem:[%s6157_s10 + $0x4] sm:$0xf] %vm1938_vm0, %v5123_v22  ;;  %4604 = vst.msk [vmem:[%s6157_s10 + $0x24] sm:$0xf] %vm1938_vm0, %v5131_v35  ;;  %v838_v40 = vcombine.low %v6058_v6, %v6294_v31  ;;  %v839_v46 = vcombine.high %v6058_v6, %v6294_v31  ;;  %v866_v10 = vrot.slane %v858_v0, %v6031_v45  ;;  %v6366_v31 = vpop.permute.xlu0 %3343 }
 0x22f   : > { %4612 = vst.msk [vmem:[%s6157_s10 + $0x44] sm:$0xf] %vm1938_vm0, %v5139_v53  ;;  %4620 = vst.msk [vmem:[%s6157_s10 + $0x64] sm:$0xf] %vm1938_vm0, %v5147_v23  ;;  %v873_v4 = vrot.slane %v859_v1, %v6031_v45  ;;  %v926_v6 = vcombine.low %v5936_v25, %v6296_v43  ;;  %v927_v61 = vcombine.high %v5936_v25, %v6296_v43  ;;  %v6396_v23 = vpop.permute.xlu1 %1985 }
 0x230   : > { %4595 = vst.msk [vmem:[%s6157_s10] sm:$0xf] %vm1938_vm0, %v5122_v55  ;;  %4603 = vst.msk [vmem:[%s6157_s10 + $0x20] sm:$0xf] %vm1938_vm0, %v5130_v60  ;;  %v830_v13 = vrot.slane %v822_v12, %v6034_v49  ;;  %v837_v42 = vrot.slane %v823_v8, %v6034_v49  ;;  %v846_v20 = vrot.slane %v838_v40, %v6034_v49 }
 0x231   : > { %4611 = vst.msk [vmem:[%s6157_s10 + $0x40] sm:$0xf] %vm1938_vm0, %v5138_v50  ;;  %4619 = vst.msk [vmem:[%s6157_s10 + $0x60] sm:$0xf] %vm1938_vm0, %v5146_v41  ;;  %v853_v0 = vrot.slane %v839_v46, %v6034_v49  ;;  %v6375_v24 = vrot.slane %v926_v6, %v6031_v45  ;;  %v6378_v52 = vrot.slane %v927_v61, %v6031_v45 }
 0x232   : > { %v874_v25 = vcombine.low %v6229_v56, %v6306_v59  ;;  %v875_v1 = vcombine.high %v6229_v56, %v6306_v59  ;;  %v1334_v43 = vcombine.low %v830_v13, %v837_v42  ;;  %v4904_v18 = vcombine.high %v830_v13, %v837_v42  ;;  %v6394_v16 = vpop.permute.xlu0 %1983 }
 0x233   : > { %v1350_v51 = vcombine.low %v846_v20, %v853_v0  ;;  %v4905_v14 = vcombine.high %v846_v20, %v853_v0  ;;  %v942_v32 = vcombine.low %v6258_v47, %v6312_v37  ;;  %v943_v34 = vcombine.high %v6258_v47, %v6312_v37 }
 0x234   : > { %v882_v44 = vrot.slane %v874_v25, %v6031_v45  ;;  %v889_v33 = vrot.slane %v875_v1, %v6031_v45  ;;  %v1341_v3 = vrot.slane %v1334_v43, %v6031_v45  ;;  %v1349_v57 = vrot.slane %v4904_v18, %v6031_v45 }
 0x235   : > { %v1357_v56 = vrot.slane %v1350_v51, %v6031_v45  ;;  %v1365_v59 = vrot.slane %v4905_v14, %v6031_v45 }
 0x236   : > { %v890_v36 = vcombine.low %v866_v10, %v882_v44  ;;  %v891_v39 = vcombine.high %v866_v10, %v882_v44  ;;  %v906_v48 = vcombine.low %v873_v4, %v889_v33  ;;  %v907_v38 = vcombine.high %v873_v4, %v889_v33  ;;  %v6410_v43 = vpop.permute.xlu0 %2007  ;;  %v6412_v33 = vpop.permute.xlu1 %2009 }
 0x237   : > { %v1366_v54 = vcombine.low %v1341_v3, %v1349_v57  ;;  %v1367_v22 = vcombine.high %v1341_v3, %v1349_v57  ;;  %v1382_v35 = vcombine.low %v1357_v56, %v1365_v59  ;;  %v1383_v53 = vcombine.high %v1357_v56, %v1365_v59 }
 0x238   : > { %v898_v47 = vrot.slane %v890_v36, %v6034_v49  ;;  %v905_v37 = vrot.slane %v891_v39, %v6034_v49  ;;  %v914_v55 = vrot.slane %v906_v48, %v6034_v49  ;;  %v921_v60 = vrot.slane %v907_v38, %v6034_v49 }
 0x239   : > { %v1374_v50 = vrot.slane %v1366_v54, %v6034_v49  ;;  %v1381_v41 = vrot.slane %v1367_v22, %v6034_v49  ;;  %v1390_v12 = vrot.slane %v1382_v35, %v6034_v49  ;;  %v1397_v8 = vrot.slane %v1383_v53, %v6034_v49 }
 0x23a   : > { %v1402_v40 = vcombine.low %v898_v47, %v905_v37  ;;  %v4906_v46 = vcombine.high %v898_v47, %v905_v37  ;;  %v1418_v10 = vcombine.low %v914_v55, %v921_v60  ;;  %v4907_v4 = vcombine.high %v914_v55, %v921_v60 }
 0x23b   : > { %v1398_v6 = vcombine.low %v1374_v50, %v1390_v12  ;;  %v1399_v61 = vcombine.high %v1374_v50, %v1390_v12  ;;  %v1400_v13 = vcombine.low %v1381_v41, %v1397_v8  ;;  %v1401_v42 = vcombine.high %v1381_v41, %v1397_v8 }
 0x23c   : > { %v1409_v20 = vrot.slane %v1402_v40, %v6031_v45  ;;  %v1417_v0 = vrot.slane %v4906_v46, %v6031_v45  ;;  %v1425_v25 = vrot.slane %v1418_v10, %v6031_v45  ;;  %v1433_v1 = vrot.slane %v4907_v4, %v6031_v45  ;;  %v6440_v40 = vpop.permute.xlu1 %2033 }
 0x23d   : > { %v5059_v18 = vpack.c.bf16 %v1398_v6, %v1398_v6  ;;  %v5067_v51 = vpack.c.bf16 %v1399_v61, %v1399_v61  ;;  %v5075_v14 = vpack.c.bf16 %v1400_v13, %v1400_v13  ;;  %v5083_v44 = vpack.c.bf16 %v1401_v42, %v1401_v42 }
 0x23e   : > { %v1434_v3 = vcombine.low %v1409_v20, %v1417_v0  ;;  %v1435_v57 = vcombine.high %v1409_v20, %v1417_v0  ;;  %v1450_v56 = vcombine.low %v1425_v25, %v1433_v1  ;;  %v1451_v59 = vcombine.high %v1425_v25, %v1433_v1 }
 0x23f   : > { %1940 = vst.msk [vmem:[%s6114_s7 + $0x4] sm:$0xf] %vm1938_vm0, %v5059_v18  ;;  %1948 = vst.msk [vmem:[%s6114_s7 + $0x24] sm:$0xf] %vm1938_vm0, %v5067_v51  ;;  %v950_v36 = vrot.slane %v942_v32, %v6031_v45  ;;  %v957_v39 = vrot.slane %v943_v34, %v6031_v45  ;;  %v3787_v48 = vcombine.low %v5947_v26, %v6366_v31 }
 0x240   : > { %1956 = vst.msk [vmem:[%s6114_s7 + $0x44] sm:$0xf] %vm1938_vm0, %v5075_v14  ;;  %1964 = vst.msk [vmem:[%s6114_s7 + $0x64] sm:$0xf] %vm1938_vm0, %v5083_v44  ;;  %v3788_v38 = vcombine.high %v5947_v26, %v6366_v31  ;;  %v1442_v54 = vrot.slane %v1434_v3, %v6034_v49  ;;  %v1449_v22 = vrot.slane %v1435_v57, %v6034_v49  ;;  %v2032_v31 = vpop.permute.xlu0 %2031 }
 0x241   : > { %v1458_v35 = vrot.slane %v1450_v56, %v6034_v49  ;;  %v1465_v53 = vrot.slane %v1451_v59, %v6034_v49  ;;  %v958_v47 = vcombine.low %v6375_v24, %v950_v36  ;;  %v959_v32 = vcombine.high %v6375_v24, %v950_v36 }
 0x242   : > { %v974_v34 = vcombine.low %v6378_v52, %v957_v39  ;;  %v975_v37 = vcombine.high %v6378_v52, %v957_v39  ;;  %v6451_v20 = vrot.slane %v3787_v48, %v6031_v45  ;;  %v6454_v0 = vrot.slane %v3788_v38, %v6031_v45  ;;  %v6470_v38 = vpop.permute.xlu1 %3317 }
 0x243   : > { %v1466_v55 = vcombine.low %v1442_v54, %v1458_v35  ;;  %v1467_v60 = vcombine.high %v1442_v54, %v1458_v35  ;;  %v1468_v50 = vcombine.low %v1449_v22, %v1465_v53  ;;  %v1469_v26 = vcombine.high %v1449_v22, %v1465_v53 }
 0x244   : > { %v966_v41 = vrot.slane %v958_v47, %v6034_v49  ;;  %v973_v12 = vrot.slane %v959_v32, %v6034_v49  ;;  %v982_v8 = vrot.slane %v974_v34, %v6034_v49  ;;  %v989_v24 = vrot.slane %v975_v37, %v6034_v49  ;;  %v6468_v56 = vpop.permute.xlu0 %3315 }
 0x245   : > { %v5060_v52 = vpack.c.bf16 %v1466_v55, %v1466_v55  ;;  %v5068_v46 = vpack.c.bf16 %v1467_v60, %v1467_v60  ;;  %v5076_v10 = vpack.c.bf16 %v1468_v50, %v1468_v50  ;;  %v5084_v4 = vpack.c.bf16 %v1469_v26, %v1469_v26 }
 0x246   : > { %v1470_v6 = vcombine.low %v966_v41, %v973_v12  ;;  %v4908_v61 = vcombine.high %v966_v41, %v973_v12  ;;  %v1486_v13 = vcombine.low %v982_v8, %v989_v24  ;;  %v4909_v42 = vcombine.high %v982_v8, %v989_v24 }
 0x247   : > { %1941 = vst.msk [vmem:[%s6114_s7 + $0x8] sm:$0xf] %vm1938_vm0, %v5060_v52  ;;  %1949 = vst.msk [vmem:[%s6114_s7 + $0x28] sm:$0xf] %vm1938_vm0, %v5068_v46  ;;  %v3855_v14 = vcombine.low %v5954_v27, %v6372_v30  ;;  %v3856_v44 = vcombine.high %v5954_v27, %v6372_v30  ;;  %v2187_v3 = vcombine.low %v5963_v28, %v6410_v43 }
 0x248   : > { %1957 = vst.msk [vmem:[%s6114_s7 + $0x48] sm:$0xf] %vm1938_vm0, %v5076_v10  ;;  %1965 = vst.msk [vmem:[%s6114_s7 + $0x68] sm:$0xf] %vm1938_vm0, %v5084_v4  ;;  %v1477_v25 = vrot.slane %v1470_v6, %v6031_v45  ;;  %v1485_v1 = vrot.slane %v4908_v61, %v6031_v45  ;;  %v1493_v18 = vrot.slane %v1486_v13, %v6031_v45  ;;  %v6492_v52 = vpop.permute.xlu0 %3339  ;;  %v6494_v4 = vpop.permute.xlu1 %3341 }
 0x249   : > { %v1501_v51 = vrot.slane %v4909_v42, %v6031_v45  ;;  %v2188_v57 = vcombine.high %v5963_v28, %v6410_v43  ;;  %v2195_v54 = vrot.slane %v2187_v3, %v6031_v45  ;;  %v2255_v35 = vcombine.low %v5968_v29, %v6412_v33 }
 0x24a   : > { %v1502_v59 = vcombine.low %v1477_v25, %v1485_v1  ;;  %v1503_v36 = vcombine.high %v1477_v25, %v1485_v1  ;;  %v2256_v53 = vcombine.high %v5968_v29, %v6412_v33  ;;  %v2203_v55 = vcombine.low %v6394_v16, %v2032_v31 }
 0x24b   : > { %v1518_v39 = vcombine.low %v1493_v18, %v1501_v51  ;;  %v1519_v48 = vcombine.high %v1493_v18, %v1501_v51  ;;  %v2202_v22 = vrot.slane %v2188_v57, %v6031_v45  ;;  %v2263_v34 = vrot.slane %v2255_v35, %v6031_v45 }
 0x24c   : > { %v1510_v28 = vrot.slane %v1502_v59, %v6034_v49  ;;  %v1517_v43 = vrot.slane %v1503_v36, %v6034_v49  ;;  %v2270_v37 = vrot.slane %v2256_v53, %v6031_v45  ;;  %v2204_v60 = vcombine.high %v6394_v16, %v2032_v31 }
 0x24d   : > { %v1526_v47 = vrot.slane %v1518_v39, %v6034_v49  ;;  %v1533_v32 = vrot.slane %v1519_v48, %v6034_v49  ;;  %v2211_v33 = vrot.slane %v2203_v55, %v6031_v45  ;;  %v2271_v8 = vcombine.low %v6396_v23, %v6440_v40 }
 0x24e   : > { %v2218_v12 = vrot.slane %v2204_v60, %v6031_v45  ;;  %v2272_v24 = vcombine.high %v6396_v23, %v6440_v40  ;;  %v3651_v25 = vcombine.low %v5861_v63, %v6492_v52  ;;  %v3652_v1 = vcombine.high %v5861_v63, %v6492_v52  ;;  %v6520_v60 = vpop.permute.xlu1 %3365 }
 0x24f   : > { %v1534_v50 = vcombine.low %v1510_v28, %v1526_v47  ;;  %v1535_v26 = vcombine.high %v1510_v28, %v1526_v47  ;;  %v1536_v41 = vcombine.low %v1517_v43, %v1533_v32  ;;  %v1537_v29 = vcombine.high %v1517_v43, %v1533_v32  ;;  %v6514_v28 = vpop.permute.xlu0 %3363 }
 0x250   : > { %v2219_v6 = vcombine.low %v2195_v54, %v2211_v33  ;;  %v2220_v61 = vcombine.high %v2195_v54, %v2211_v33  ;;  %v2235_v13 = vcombine.low %v2202_v22, %v2218_v12  ;;  %v2236_v42 = vcombine.high %v2202_v22, %v2218_v12 }
 0x251   : > { %v5061_v16 = vpack.c.bf16 %v1534_v50, %v1534_v50  ;;  %v5069_v31 = vpack.c.bf16 %v1535_v26, %v1535_v26  ;;  %v5077_v46 = vpack.c.bf16 %v1536_v41, %v1536_v41  ;;  %v5085_v10 = vpack.c.bf16 %v1537_v29, %v1537_v29 }
 0x252   : > { %v2279_v23 = vrot.slane %v2271_v8, %v6031_v45  ;;  %v2286_v40 = vrot.slane %v2272_v24, %v6031_v45  ;;  %v2227_v18 = vrot.slane %v2219_v6, %v6034_v49  ;;  %v2234_v51 = vrot.slane %v2220_v61, %v6034_v49 }
 0x253   : > { %1942 = vst.msk [vmem:[%s6114_s7 + $0xc] sm:$0xf] %vm1938_vm0, %v5061_v16  ;;  %1950 = vst.msk [vmem:[%s6114_s7 + $0x2c] sm:$0xf] %vm1938_vm0, %v5069_v31  ;;  %v2243_v3 = vrot.slane %v2235_v13, %v6034_v49  ;;  %v2250_v57 = vrot.slane %v2236_v42, %v6034_v49  ;;  %v3667_v52 = vcombine.low %v6468_v56, %v6514_v28 }
 0x254   : > { %1958 = vst.msk [vmem:[%s6114_s7 + $0x4c] sm:$0xf] %vm1938_vm0, %v5077_v46  ;;  %1966 = vst.msk [vmem:[%s6114_s7 + $0x6c] sm:$0xf] %vm1938_vm0, %v5085_v10  ;;  %v2287_v59 = vcombine.low %v2263_v34, %v2279_v23  ;;  %v2288_v36 = vcombine.high %v2263_v34, %v2279_v23  ;;  %v2303_v39 = vcombine.low %v2270_v37, %v2286_v40 }
 0x255   : > { %v2304_v48 = vcombine.high %v2270_v37, %v2286_v40  ;;  %v2731_v54 = vcombine.low %v2227_v18, %v2234_v51  ;;  %v4954_v22 = vcombine.high %v2227_v18, %v2234_v51  ;;  %v2747_v35 = vcombine.low %v2243_v3, %v2250_v57  ;;  %v6534_v18 = vpop.permute.xlu0 %658 }
 0x256   : > { %v4955_v53 = vcombine.high %v2243_v3, %v2250_v57  ;;  %v2295_v43 = vrot.slane %v2287_v59, %v6034_v49  ;;  %v2302_v47 = vrot.slane %v2288_v36, %v6034_v49  ;;  %v2311_v32 = vrot.slane %v2303_v39, %v6034_v49  ;;  %v6536_v36 = vpop.permute.xlu1 %660 }
 0x257   : > { %v2318_v55 = vrot.slane %v2304_v48, %v6034_v49  ;;  %v2738_v34 = vrot.slane %v2731_v54, %v6031_v45  ;;  %v2746_v37 = vrot.slane %v4954_v22, %v6031_v45  ;;  %v2754_v50 = vrot.slane %v2747_v35, %v6031_v45 }
 0x258   : > { %v2762_v26 = vrot.slane %v4955_v53, %v6031_v45  ;;  %v2799_v41 = vcombine.low %v2295_v43, %v2302_v47  ;;  %v4956_v29 = vcombine.high %v2295_v43, %v2302_v47 }
 0x259   : > { %v2815_v33 = vcombine.low %v2311_v32, %v2318_v55  ;;  %v4957_v12 = vcombine.high %v2311_v32, %v2318_v55  ;;  %v2763_v8 = vcombine.low %v2738_v34, %v2746_v37  ;;  %v2764_v24 = vcombine.high %v2738_v34, %v2746_v37 }
 0x25a   : > { %v2779_v16 = vcombine.low %v2754_v50, %v2762_v26  ;;  %v2780_v31 = vcombine.high %v2754_v50, %v2762_v26  ;;  %v2806_v46 = vrot.slane %v2799_v41, %v6031_v45  ;;  %v2814_v10 = vrot.slane %v4956_v29, %v6031_v45 }
 0x25b   : > { %v2822_v6 = vrot.slane %v2815_v33, %v6031_v45  ;;  %v2830_v61 = vrot.slane %v4957_v12, %v6031_v45  ;;  %v2771_v13 = vrot.slane %v2763_v8, %v6034_v49  ;;  %v2778_v42 = vrot.slane %v2764_v24, %v6034_v49 }
 0x25c   : > { %v2787_v23 = vrot.slane %v2779_v16, %v6034_v49  ;;  %v2794_v40 = vrot.slane %v2780_v31, %v6034_v49  ;;  %v2831_v51 = vcombine.low %v2806_v46, %v2814_v10  ;;  %v2832_v3 = vcombine.high %v2806_v46, %v2814_v10  ;;  %v683_v16 = vpop.permute.xlu0 %682 }
 0x25d   : > { %v2847_v57 = vcombine.low %v2822_v6, %v2830_v61  ;;  %v2848_v59 = vcombine.high %v2822_v6, %v2830_v61  ;;  %v3659_v33 = vrot.slane %v3651_v25, %v6031_v45  ;;  %v3666_v12 = vrot.slane %v3652_v1, %v6031_v45  ;;  %v6562_v61 = vpop.permute.xlu1 %684 }
 0x25e   : > { %v2795_v39 = vcombine.low %v2771_v13, %v2787_v23  ;;  %v2796_v48 = vcombine.high %v2771_v13, %v2787_v23  ;;  %v2797_v54 = vcombine.low %v2778_v42, %v2794_v40  ;;  %v2798_v22 = vcombine.high %v2778_v42, %v2794_v40 }
 0x25f   : > { %v2839_v35 = vrot.slane %v2831_v51, %v6034_v49  ;;  %v2846_v53 = vrot.slane %v2832_v3, %v6034_v49  ;;  %v2855_v43 = vrot.slane %v2847_v57, %v6034_v49  ;;  %v2862_v47 = vrot.slane %v2848_v59, %v6034_v49 }
 0x260   : > { %v5092_v32 = vpack.c.bf16 %v2795_v39, %v2795_v39  ;;  %v5100_v55 = vpack.c.bf16 %v2796_v48, %v2796_v48  ;;  %v5108_v34 = vpack.c.bf16 %v2797_v54, %v2797_v54  ;;  %v5116_v37 = vpack.c.bf16 %v2798_v22, %v2798_v22 }
 0x261   : > { %v2863_v50 = vcombine.low %v2839_v35, %v2855_v43  ;;  %v2864_v26 = vcombine.high %v2839_v35, %v2855_v43  ;;  %v2865_v41 = vcombine.low %v2846_v53, %v2862_v47  ;;  %v2866_v29 = vcombine.high %v2846_v53, %v2862_v47 }
 0x262   : > { %3269 = vst.msk [vmem:[%s6236_s16 + $0x8] sm:$0xf] %vm1938_vm0, %v5092_v32  ;;  %3277 = vst.msk [vmem:[%s6236_s16 + $0x28] sm:$0xf] %vm1938_vm0, %v5100_v55  ;;  %v3719_v8 = vcombine.low %v5866_v2, %v6494_v4  ;;  %v3720_v24 = vcombine.high %v5866_v2, %v6494_v4  ;;  %v3668_v1 = vcombine.high %v6468_v56, %v6514_v28  ;;  %v6602_v55 = vpop.permute.xlu0 %706 }
 0x263   : > { %3285 = vst.msk [vmem:[%s6236_s16 + $0x48] sm:$0xf] %vm1938_vm0, %v5108_v34  ;;  %3293 = vst.msk [vmem:[%s6236_s16 + $0x68] sm:$0xf] %vm1938_vm0, %v5116_v37  ;;  %v5093_v31 = vpack.c.bf16 %v2863_v50, %v2863_v50  ;;  %v5101_v46 = vpack.c.bf16 %v2864_v26, %v2864_v26  ;;  %v5109_v10 = vpack.c.bf16 %v2865_v41, %v2865_v41  ;;  %v6608_v41 = vpop.permute.xlu1 %708 }
 0x264   : > { %v5117_v6 = vpack.c.bf16 %v2866_v29, %v2866_v29  ;;  %v3727_v25 = vrot.slane %v3719_v8, %v6031_v45  ;;  %v3734_v63 = vrot.slane %v3720_v24, %v6031_v45  ;;  %v3735_v2 = vcombine.low %v6470_v38, %v6520_v60 }
 0x265   : > { %3270 = vst.msk [vmem:[%s6236_s16 + $0xc] sm:$0xf] %vm1938_vm0, %v5093_v31  ;;  %3278 = vst.msk [vmem:[%s6236_s16 + $0x2c] sm:$0xf] %vm1938_vm0, %v5101_v46  ;;  %v3736_v4 = vcombine.high %v6470_v38, %v6520_v60  ;;  %v994_v13 = vcombine.low %v5871_v5, %v683_v16  ;;  %v995_v42 = vcombine.high %v5871_v5, %v683_v16 }
 0x266   : > { %3286 = vst.msk [vmem:[%s6236_s16 + $0x4c] sm:$0xf] %vm1938_vm0, %v5109_v10  ;;  %3294 = vst.msk [vmem:[%s6236_s16 + $0x6c] sm:$0xf] %vm1938_vm0, %v5117_v6  ;;  %v3675_v56 = vrot.slane %v3667_v52, %v6031_v45  ;;  %v3682_v28 = vrot.slane %v3668_v1, %v6031_v45  ;;  %v1062_v23 = vcombine.low %v5878_v9, %v6562_v61 }
 0x267   : > { %v1063_v40 = vcombine.high %v5878_v9, %v6562_v61  ;;  %v3743_v51 = vrot.slane %v3735_v2, %v6031_v45  ;;  %v3750_v3 = vrot.slane %v3736_v4, %v6031_v45  ;;  %v6593_v38 = vrot.slane %v994_v13, %v6031_v45 }
 0x268   : > { %v6596_v60 = vrot.slane %v995_v42, %v6031_v45  ;;  %v3683_v5 = vcombine.low %v3659_v33, %v3675_v56  ;;  %v3684_v57 = vcombine.high %v3659_v33, %v3675_v56  ;;  %v3699_v59 = vcombine.low %v3666_v12, %v3682_v28 }
 0x269   : > { %v3700_v39 = vcombine.high %v3666_v12, %v3682_v28  ;;  %v3751_v48 = vcombine.low %v3727_v25, %v3743_v51  ;;  %v3752_v54 = vcombine.high %v3727_v25, %v3743_v51  ;;  %v3767_v22 = vcombine.low %v3734_v63, %v3750_v3  ;;  %v6618_v51 = vpop.permute.xlu0 %1987 }
 0x26a   : > { %v3768_v35 = vcombine.high %v3734_v63, %v3750_v3  ;;  %v3691_v53 = vrot.slane %v3683_v5, %v6034_v49  ;;  %v3698_v43 = vrot.slane %v3684_v57, %v6034_v49  ;;  %v3707_v47 = vrot.slane %v3699_v59, %v6034_v49 }
 0x26b   : > { %v3714_v32 = vrot.slane %v3700_v39, %v6034_v49  ;;  %v3759_v34 = vrot.slane %v3751_v48, %v6034_v49  ;;  %v3766_v37 = vrot.slane %v3752_v54, %v6034_v49  ;;  %v3775_v50 = vrot.slane %v3767_v22, %v6034_v49  ;;  %v6620_v39 = vpop.permute.xlu1 %1989 }
 0x26c   : > { %v3782_v26 = vrot.slane %v3768_v35, %v6034_v49  ;;  %v4195_v29 = vcombine.low %v3691_v53, %v3698_v43  ;;  %v5006_v33 = vcombine.high %v3691_v53, %v3698_v43  ;;  %v1079_v9 = vcombine.high %v6536_v36, %v6608_v41 }
 0x26d   : > { %v4211_v12 = vcombine.low %v3707_v47, %v3714_v32  ;;  %v5007_v8 = vcombine.high %v3707_v47, %v3714_v32  ;;  %v4263_v24 = vcombine.low %v3759_v34, %v3766_v37  ;;  %v5008_v16 = vcombine.high %v3759_v34, %v3766_v37 }
 0x26e   : > { %v4279_v31 = vcombine.low %v3775_v50, %v3782_v26  ;;  %v5009_v46 = vcombine.high %v3775_v50, %v3782_v26  ;;  %v4202_v10 = vrot.slane %v4195_v29, %v6031_v45  ;;  %v4210_v6 = vrot.slane %v5006_v33, %v6031_v45 }
 0x26f   : > { %v4218_v25 = vrot.slane %v4211_v12, %v6031_v45  ;;  %v4226_v63 = vrot.slane %v5007_v8, %v6031_v45  ;;  %v4270_v52 = vrot.slane %v4263_v24, %v6031_v45  ;;  %v4278_v1 = vrot.slane %v5008_v16, %v6031_v45 }
 0x270   : > { %v4286_v2 = vrot.slane %v4279_v31, %v6031_v45  ;;  %v4294_v4 = vrot.slane %v5009_v46, %v6031_v45  ;;  %v4227_v13 = vcombine.low %v4202_v10, %v4210_v6  ;;  %v4228_v42 = vcombine.high %v4202_v10, %v4210_v6  ;;  %v2012_v10 = vpop.permute.xlu0 %2011 }
 0x271   : > { %v4243_v56 = vcombine.low %v4218_v25, %v4226_v63  ;;  %v4244_v28 = vcombine.high %v4218_v25, %v4226_v63  ;;  %v4295_v3 = vcombine.low %v4270_v52, %v4278_v1  ;;  %v4296_v5 = vcombine.high %v4270_v52, %v4278_v1  ;;  %v6630_v1 = vpop.permute.xlu1 %2013 }
 0x272   : > { %v4311_v57 = vcombine.low %v4286_v2, %v4294_v4  ;;  %v4312_v59 = vcombine.high %v4286_v2, %v4294_v4  ;;  %v4235_v48 = vrot.slane %v4227_v13, %v6034_v49  ;;  %v4242_v54 = vrot.slane %v4228_v42, %v6034_v49 }
 0x273   : > { %v4251_v22 = vrot.slane %v4243_v56, %v6034_v49  ;;  %v4258_v35 = vrot.slane %v4244_v28, %v6034_v49  ;;  %v4303_v53 = vrot.slane %v4295_v3, %v6034_v49  ;;  %v4310_v43 = vrot.slane %v4296_v5, %v6034_v49 }
 0x274   : > { %v4319_v47 = vrot.slane %v4311_v57, %v6034_v49  ;;  %v4326_v32 = vrot.slane %v4312_v59, %v6034_v49  ;;  %v1070_v2 = vrot.slane %v1062_v23, %v6031_v45  ;;  %v1077_v4 = vrot.slane %v1063_v40, %v6031_v45 }
 0x275   : > { %v4259_v34 = vcombine.low %v4235_v48, %v4251_v22  ;;  %v4260_v37 = vcombine.high %v4235_v48, %v4251_v22  ;;  %v4261_v50 = vcombine.low %v4242_v54, %v4258_v35  ;;  %v4262_v26 = vcombine.high %v4242_v54, %v4258_v35 }
 0x276   : > { %v4327_v29 = vcombine.low %v4303_v53, %v4319_v47  ;;  %v4328_v33 = vcombine.high %v4303_v53, %v4319_v47  ;;  %v4329_v12 = vcombine.low %v4310_v43, %v4326_v32  ;;  %v4330_v8 = vcombine.high %v4310_v43, %v4326_v32 }
 0x277   : > { %v5126_v24 = vpack.c.bf16 %v4259_v34, %v4259_v34  ;;  %v5134_v16 = vpack.c.bf16 %v4260_v37, %v4260_v37  ;;  %v5142_v31 = vpack.c.bf16 %v4261_v50, %v4261_v50  ;;  %v5150_v46 = vpack.c.bf16 %v4262_v26, %v4262_v26  ;;  %v6688_v37 = vpop.permute.xlu0 %2035 }
 0x278   : > { %v5127_v6 = vpack.c.bf16 %v4327_v29, %v4327_v29  ;;  %v5135_v25 = vpack.c.bf16 %v4328_v33, %v4328_v33  ;;  %v5143_v63 = vpack.c.bf16 %v4329_v12, %v4329_v12  ;;  %v5151_v52 = vpack.c.bf16 %v4330_v8, %v4330_v8  ;;  %v6694_v29 = vpop.permute.xlu1 %2037 }
 0x279   : > { %4599 = vst.msk [vmem:[%s6157_s10 + $0x10] sm:$0xf] %vm1938_vm0, %v5126_v24  ;;  %4607 = vst.msk [vmem:[%s6157_s10 + $0x30] sm:$0xf] %vm1938_vm0, %v5134_v16  ;;  %v1010_v13 = vcombine.low %v6534_v18, %v6602_v55  ;;  %v1011_v42 = vcombine.high %v6534_v18, %v6602_v55  ;;  %v1078_v23 = vcombine.low %v6536_v36, %v6608_v41 }
 0x27a   : > { %4615 = vst.msk [vmem:[%s6157_s10 + $0x50] sm:$0xf] %vm1938_vm0, %v5142_v31  ;;  %4623 = vst.msk [vmem:[%s6157_s10 + $0x70] sm:$0xf] %vm1938_vm0, %v5150_v46  ;;  %v2323_v61 = vcombine.low %v5873_v7, %v2012_v10  ;;  %v2324_v40 = vcombine.high %v5873_v7, %v2012_v10  ;;  %v2391_v56 = vcombine.low %v5880_v11, %v6630_v1 }
 0x27b   : > { %4600 = vst.msk [vmem:[%s6157_s10 + $0x14] sm:$0xf] %vm1938_vm0, %v5127_v6  ;;  %4608 = vst.msk [vmem:[%s6157_s10 + $0x34] sm:$0xf] %vm1938_vm0, %v5135_v25  ;;  %v1018_v18 = vrot.slane %v1010_v13, %v6031_v45  ;;  %v1025_v55 = vrot.slane %v1011_v42, %v6031_v45  ;;  %v2392_v28 = vcombine.high %v5880_v11, %v6630_v1 }
 0x27c   : > { %4616 = vst.msk [vmem:[%s6157_s10 + $0x54] sm:$0xf] %vm1938_vm0, %v5143_v63  ;;  %4624 = vst.msk [vmem:[%s6157_s10 + $0x74] sm:$0xf] %vm1938_vm0, %v5151_v52  ;;  %v1086_v3 = vrot.slane %v1078_v23, %v6031_v45  ;;  %v1093_v5 = vrot.slane %v1079_v9, %v6031_v45  ;;  %v6675_v36 = vrot.slane %v2323_v61, %v6031_v45 }
 0x27d   : > { %v6678_v41 = vrot.slane %v2324_v40, %v6031_v45  ;;  %v1026_v7 = vcombine.low %v6593_v38, %v1018_v18  ;;  %v1027_v57 = vcombine.high %v6593_v38, %v1018_v18  ;;  %v1042_v59 = vcombine.low %v6596_v60, %v1025_v55  ;;  %v6704_v18 = vpop.permute.xlu0 %662 }
 0x27e   : > { %v1043_v48 = vcombine.high %v6596_v60, %v1025_v55  ;;  %v1094_v54 = vcombine.low %v1070_v2, %v1086_v3  ;;  %v1095_v22 = vcombine.high %v1070_v2, %v1086_v3  ;;  %v1110_v35 = vcombine.low %v1077_v4, %v1093_v5 }
 0x27f   : > { %v1111_v53 = vcombine.high %v1077_v4, %v1093_v5  ;;  %v1034_v43 = vrot.slane %v1026_v7, %v6034_v49  ;;  %v1041_v47 = vrot.slane %v1027_v57, %v6034_v49  ;;  %v1050_v32 = vrot.slane %v1042_v59, %v6034_v49  ;;  %v6706_v57 = vpop.permute.xlu1 %664 }
 0x280   : > { %v1057_v34 = vrot.slane %v1043_v48, %v6034_v49  ;;  %v1102_v38 = vrot.slane %v1094_v54, %v6034_v49  ;;  %v1109_v50 = vrot.slane %v1095_v22, %v6034_v49  ;;  %v1118_v60 = vrot.slane %v1110_v35, %v6034_v49 }
 0x281   : > { %v1125_v26 = vrot.slane %v1111_v53, %v6034_v49  ;;  %v1538_v33 = vcombine.low %v1034_v43, %v1041_v47  ;;  %v4910_v12 = vcombine.high %v1034_v43, %v1041_v47  ;;  %v2408_v11 = vcombine.high %v6620_v39, %v6694_v29 }
 0x282   : > { %v1554_v8 = vcombine.low %v1050_v32, %v1057_v34  ;;  %v4911_v24 = vcombine.high %v1050_v32, %v1057_v34  ;;  %v1606_v16 = vcombine.low %v1102_v38, %v1109_v50  ;;  %v4912_v31 = vcombine.high %v1102_v38, %v1109_v50 }
 0x283   : > { %v1622_v46 = vcombine.low %v1118_v60, %v1125_v26  ;;  %v4913_v10 = vcombine.high %v1118_v60, %v1125_v26  ;;  %v1545_v6 = vrot.slane %v1538_v33, %v6031_v45  ;;  %v1553_v25 = vrot.slane %v4910_v12, %v6031_v45 }
 0x284   : > { %v1561_v63 = vrot.slane %v1554_v8, %v6031_v45  ;;  %v1569_v52 = vrot.slane %v4911_v24, %v6031_v45  ;;  %v1613_v2 = vrot.slane %v1606_v16, %v6031_v45  ;;  %v1621_v4 = vrot.slane %v4912_v31, %v6031_v45 }
 0x285   : > { %v1629_v13 = vrot.slane %v1622_v46, %v6031_v45  ;;  %v1637_v42 = vrot.slane %v4913_v10, %v6031_v45  ;;  %v1570_v23 = vcombine.low %v1545_v6, %v1553_v25  ;;  %v1571_v9 = vcombine.high %v1545_v6, %v1553_v25  ;;  %v687_v46 = vpop.permute.xlu0 %686 }
 0x286   : > { %v1586_v61 = vcombine.low %v1561_v63, %v1569_v52  ;;  %v1587_v40 = vcombine.high %v1561_v63, %v1569_v52  ;;  %v1638_v55 = vcombine.low %v1613_v2, %v1621_v4  ;;  %v1639_v3 = vcombine.high %v1613_v2, %v1621_v4  ;;  %v6716_v52 = vpop.permute.xlu1 %688 }
 0x287   : > { %v1654_v5 = vcombine.low %v1629_v13, %v1637_v42  ;;  %v1655_v7 = vcombine.high %v1629_v13, %v1637_v42  ;;  %v1578_v59 = vrot.slane %v1570_v23, %v6034_v49  ;;  %v1585_v48 = vrot.slane %v1571_v9, %v6034_v49 }
 0x288   : > { %v1594_v54 = vrot.slane %v1586_v61, %v6034_v49  ;;  %v1601_v22 = vrot.slane %v1587_v40, %v6034_v49  ;;  %v1646_v35 = vrot.slane %v1638_v55, %v6034_v49  ;;  %v1653_v53 = vrot.slane %v1639_v3, %v6034_v49 }
 0x289   : > { %v1662_v43 = vrot.slane %v1654_v5, %v6034_v49  ;;  %v1669_v47 = vrot.slane %v1655_v7, %v6034_v49  ;;  %v2399_v2 = vrot.slane %v2391_v56, %v6031_v45  ;;  %v2406_v4 = vrot.slane %v2392_v28, %v6031_v45 }
 0x28a   : > { %v1602_v32 = vcombine.low %v1578_v59, %v1594_v54  ;;  %v1603_v34 = vcombine.high %v1578_v59, %v1594_v54  ;;  %v1604_v38 = vcombine.low %v1585_v48, %v1601_v22  ;;  %v1605_v50 = vcombine.high %v1585_v48, %v1601_v22 }
 0x28b   : > { %v1670_v60 = vcombine.low %v1646_v35, %v1662_v43  ;;  %v1671_v26 = vcombine.high %v1646_v35, %v1662_v43  ;;  %v1672_v33 = vcombine.low %v1653_v53, %v1669_v47  ;;  %v1673_v12 = vcombine.high %v1653_v53, %v1669_v47  ;;  %v6774_v47 = vpop.permute.xlu0 %710 }
 0x28c   : > { %v5062_v8 = vpack.c.bf16 %v1602_v32, %v1602_v32  ;;  %v5070_v24 = vpack.c.bf16 %v1603_v34, %v1603_v34  ;;  %v5078_v16 = vpack.c.bf16 %v1604_v38, %v1604_v38  ;;  %v5086_v31 = vpack.c.bf16 %v1605_v50, %v1605_v50  ;;  %v6780_v38 = vpop.permute.xlu1 %712 }
 0x28d   : > { %v5063_v10 = vpack.c.bf16 %v1670_v60, %v1670_v60  ;;  %v5071_v6 = vpack.c.bf16 %v1671_v26, %v1671_v26  ;;  %v5079_v25 = vpack.c.bf16 %v1672_v33, %v1672_v33  ;;  %v5087_v63 = vpack.c.bf16 %v1673_v12, %v1673_v12 }
 0x28e   : > { %1943 = vst.msk [vmem:[%s6114_s7 + $0x10] sm:$0xf] %vm1938_vm0, %v5062_v8  ;;  %1951 = vst.msk [vmem:[%s6114_s7 + $0x30] sm:$0xf] %vm1938_vm0, %v5070_v24  ;;  %v2339_v13 = vcombine.low %v6618_v51, %v6688_v37  ;;  %v2340_v42 = vcombine.high %v6618_v51, %v6688_v37  ;;  %v2407_v56 = vcombine.low %v6620_v39, %v6694_v29 }
 0x28f   : > { %1959 = vst.msk [vmem:[%s6114_s7 + $0x50] sm:$0xf] %vm1938_vm0, %v5078_v16  ;;  %1967 = vst.msk [vmem:[%s6114_s7 + $0x70] sm:$0xf] %vm1938_vm0, %v5086_v31  ;;  %v1130_v1 = vcombine.low %v5893_v15, %v687_v46  ;;  %v1131_v28 = vcombine.high %v5893_v15, %v687_v46  ;;  %v1198_v23 = vcombine.low %v5900_v19, %v6716_v52 }
 0x290   : > { %1944 = vst.msk [vmem:[%s6114_s7 + $0x14] sm:$0xf] %vm1938_vm0, %v5063_v10  ;;  %1952 = vst.msk [vmem:[%s6114_s7 + $0x34] sm:$0xf] %vm1938_vm0, %v5071_v6  ;;  %v2347_v51 = vrot.slane %v2339_v13, %v6031_v45  ;;  %v2354_v37 = vrot.slane %v2340_v42, %v6031_v45  ;;  %v1199_v9 = vcombine.high %v5900_v19, %v6716_v52 }
 0x291   : > { %1960 = vst.msk [vmem:[%s6114_s7 + $0x54] sm:$0xf] %vm1938_vm0, %v5079_v25  ;;  %1968 = vst.msk [vmem:[%s6114_s7 + $0x74] sm:$0xf] %vm1938_vm0, %v5087_v63  ;;  %v2415_v61 = vrot.slane %v2407_v56, %v6031_v45  ;;  %v2422_v40 = vrot.slane %v2408_v11, %v6031_v45  ;;  %v6761_v39 = vrot.slane %v1130_v1, %v6031_v45  ;;  %v6790_v1 = vpop.permute.xlu0 %1991 }
 0x292   : > { %v6764_v29 = vrot.slane %v1131_v28, %v6031_v45  ;;  %v2355_v15 = vcombine.low %v6675_v36, %v2347_v51  ;;  %v2356_v55 = vcombine.high %v6675_v36, %v2347_v51  ;;  %v2371_v3 = vcombine.low %v6678_v41, %v2354_v37 }
 0x293   : > { %v2372_v5 = vcombine.high %v6678_v41, %v2354_v37  ;;  %v2423_v7 = vcombine.low %v2399_v2, %v2415_v61  ;;  %v2424_v59 = vcombine.high %v2399_v2, %v2415_v61  ;;  %v2439_v48 = vcombine.low %v2406_v4, %v2422_v40 }
 0x294   : > { %v2440_v54 = vcombine.high %v2406_v4, %v2422_v40  ;;  %v2363_v22 = vrot.slane %v2355_v15, %v6034_v49  ;;  %v2370_v35 = vrot.slane %v2356_v55, %v6034_v49  ;;  %v2379_v53 = vrot.slane %v2371_v3, %v6034_v49  ;;  %v6792_v40 = vpop.permute.xlu1 %1993 }
 0x295   : > { %v2386_v43 = vrot.slane %v2372_v5, %v6034_v49  ;;  %v2431_v36 = vrot.slane %v2423_v7, %v6034_v49  ;;  %v2438_v32 = vrot.slane %v2424_v59, %v6034_v49  ;;  %v2447_v41 = vrot.slane %v2439_v48, %v6034_v49 }
 0x296   : > { %v2454_v34 = vrot.slane %v2440_v54, %v6034_v49  ;;  %v2867_v50 = vcombine.low %v2363_v22, %v2370_v35  ;;  %v4958_v60 = vcombine.high %v2363_v22, %v2370_v35  ;;  %v1215_v19 = vcombine.high %v6706_v57, %v6780_v38 }
 0x297   : > { %v2883_v26 = vcombine.low %v2379_v53, %v2386_v43  ;;  %v4959_v33 = vcombine.high %v2379_v53, %v2386_v43  ;;  %v2935_v12 = vcombine.low %v2431_v36, %v2438_v32  ;;  %v4960_v8 = vcombine.high %v2431_v36, %v2438_v32 }
 0x298   : > { %v2951_v24 = vcombine.low %v2447_v41, %v2454_v34  ;;  %v4961_v16 = vcombine.high %v2447_v41, %v2454_v34  ;;  %v2874_v31 = vrot.slane %v2867_v50, %v6031_v45  ;;  %v2882_v46 = vrot.slane %v4958_v60, %v6031_v45 }
 0x299   : > { %v2890_v10 = vrot.slane %v2883_v26, %v6031_v45  ;;  %v2898_v6 = vrot.slane %v4959_v33, %v6031_v45  ;;  %v2942_v25 = vrot.slane %v2935_v12, %v6031_v45  ;;  %v2950_v63 = vrot.slane %v4960_v8, %v6031_v45  ;;  %v2016_v12 = vpop.permute.xlu0 %2015 }
 0x29a   : > { %v2958_v2 = vrot.slane %v2951_v24, %v6031_v45  ;;  %v2966_v4 = vrot.slane %v4961_v16, %v6031_v45  ;;  %v2899_v13 = vcombine.low %v2874_v31, %v2882_v46  ;;  %v2900_v42 = vcombine.high %v2874_v31, %v2882_v46  ;;  %v6802_v46 = vpop.permute.xlu1 %2017 }
 0x29b   : > { %v2915_v56 = vcombine.low %v2890_v10, %v2898_v6  ;;  %v2916_v11 = vcombine.high %v2890_v10, %v2898_v6  ;;  %v2967_v28 = vcombine.low %v2942_v25, %v2950_v63  ;;  %v2968_v51 = vcombine.high %v2942_v25, %v2950_v63 }
 0x29c   : > { %v2983_v37 = vcombine.low %v2958_v2, %v2966_v4  ;;  %v2984_v61 = vcombine.high %v2958_v2, %v2966_v4  ;;  %v2907_v15 = vrot.slane %v2899_v13, %v6034_v49  ;;  %v2914_v55 = vrot.slane %v2900_v42, %v6034_v49 }
 0x29d   : > { %v2923_v3 = vrot.slane %v2915_v56, %v6034_v49  ;;  %v2930_v5 = vrot.slane %v2916_v11, %v6034_v49  ;;  %v2975_v7 = vrot.slane %v2967_v28, %v6034_v49  ;;  %v2982_v59 = vrot.slane %v2968_v51, %v6034_v49 }
 0x29e   : > { %v2991_v48 = vrot.slane %v2983_v37, %v6034_v49  ;;  %v2998_v54 = vrot.slane %v2984_v61, %v6034_v49  ;;  %v1206_v10 = vrot.slane %v1198_v23, %v6031_v45  ;;  %v1213_v6 = vrot.slane %v1199_v9, %v6031_v45 }
 0x29f   : > { %v2931_v22 = vcombine.low %v2907_v15, %v2923_v3  ;;  %v2932_v35 = vcombine.high %v2907_v15, %v2923_v3  ;;  %v2933_v53 = vcombine.low %v2914_v55, %v2930_v5  ;;  %v2934_v43 = vcombine.high %v2914_v55, %v2930_v5 }
 0x2a0   : > { %v2999_v36 = vcombine.low %v2975_v7, %v2991_v48  ;;  %v3000_v32 = vcombine.high %v2975_v7, %v2991_v48  ;;  %v3001_v41 = vcombine.low %v2982_v59, %v2998_v54  ;;  %v3002_v34 = vcombine.high %v2982_v59, %v2998_v54 }
 0x2a1   : > { %v5094_v50 = vpack.c.bf16 %v2931_v22, %v2931_v22  ;;  %v5102_v60 = vpack.c.bf16 %v2932_v35, %v2932_v35  ;;  %v5110_v26 = vpack.c.bf16 %v2933_v53, %v2933_v53  ;;  %v5118_v33 = vpack.c.bf16 %v2934_v43, %v2934_v43 }
 0x2a2   : > { %v5095_v8 = vpack.c.bf16 %v2999_v36, %v2999_v36  ;;  %v5103_v24 = vpack.c.bf16 %v3000_v32, %v3000_v32  ;;  %v5111_v16 = vpack.c.bf16 %v3001_v41, %v3001_v41  ;;  %v5119_v31 = vpack.c.bf16 %v3002_v34, %v3002_v34 }
 0x2a3   : > { %3271 = vst.msk [vmem:[%s6236_s16 + $0x10] sm:$0xf] %vm1938_vm0, %v5094_v50  ;;  %3279 = vst.msk [vmem:[%s6236_s16 + $0x30] sm:$0xf] %vm1938_vm0, %v5102_v60  ;;  %v1146_v25 = vcombine.low %v6704_v18, %v6774_v47  ;;  %v1147_v63 = vcombine.high %v6704_v18, %v6774_v47  ;;  %v1214_v23 = vcombine.low %v6706_v57, %v6780_v38 }
 0x2a4   : > { %3287 = vst.msk [vmem:[%s6236_s16 + $0x50] sm:$0xf] %vm1938_vm0, %v5110_v26  ;;  %3295 = vst.msk [vmem:[%s6236_s16 + $0x70] sm:$0xf] %vm1938_vm0, %v5118_v33  ;;  %v2459_v52 = vcombine.low %v5895_v17, %v2016_v12  ;;  %v2460_v9 = vcombine.high %v5895_v17, %v2016_v12  ;;  %v2527_v2 = vcombine.low %v5902_v21, %v6802_v46 }
 0x2a5   : > { %3272 = vst.msk [vmem:[%s6236_s16 + $0x14] sm:$0xf] %vm1938_vm0, %v5095_v8  ;;  %3280 = vst.msk [vmem:[%s6236_s16 + $0x34] sm:$0xf] %vm1938_vm0, %v5103_v24  ;;  %v1154_v18 = vrot.slane %v1146_v25, %v6031_v45  ;;  %v1161_v47 = vrot.slane %v1147_v63, %v6031_v45  ;;  %v2528_v4 = vcombine.high %v5902_v21, %v6802_v46  ;;  %v2040_v25 = vpop.permute.xlu0 %2039 }
 0x2a6   : > { %3288 = vst.msk [vmem:[%s6236_s16 + $0x54] sm:$0xf] %vm1938_vm0, %v5111_v16  ;;  %3296 = vst.msk [vmem:[%s6236_s16 + $0x74] sm:$0xf] %vm1938_vm0, %v5119_v31  ;;  %v1222_v13 = vrot.slane %v1214_v23, %v6031_v45  ;;  %v1229_v42 = vrot.slane %v1215_v19, %v6031_v45  ;;  %v6847_v57 = vrot.slane %v2459_v52, %v6031_v45 }
 0x2a7   : > { %v6850_v38 = vrot.slane %v2460_v9, %v6031_v45  ;;  %v1162_v17 = vcombine.low %v6761_v39, %v1154_v18  ;;  %v1163_v56 = vcombine.high %v6761_v39, %v1154_v18  ;;  %v1178_v11 = vcombine.low %v6764_v29, %v1161_v47  ;;  %v6872_v9 = vpop.permute.xlu1 %2041 }
 0x2a8   : > { %v1179_v28 = vcombine.high %v6764_v29, %v1161_v47  ;;  %v1230_v51 = vcombine.low %v1206_v10, %v1222_v13  ;;  %v1231_v37 = vcombine.high %v1206_v10, %v1222_v13  ;;  %v1246_v61 = vcombine.low %v1213_v6, %v1229_v42 }
 0x2a9   : > { %v1247_v15 = vcombine.high %v1213_v6, %v1229_v42  ;;  %v1170_v55 = vrot.slane %v1162_v17, %v6034_v49  ;;  %v1177_v3 = vrot.slane %v1163_v56, %v6034_v49  ;;  %v1186_v5 = vrot.slane %v1178_v11, %v6034_v49 }
 0x2aa   : > { %v1193_v7 = vrot.slane %v1179_v28, %v6034_v49  ;;  %v1238_v59 = vrot.slane %v1230_v51, %v6034_v49  ;;  %v1245_v39 = vrot.slane %v1231_v37, %v6034_v49  ;;  %v1254_v48 = vrot.slane %v1246_v61, %v6034_v49 }
 0x2ab   : > { %v1261_v29 = vrot.slane %v1247_v15, %v6034_v49  ;;  %v1674_v54 = vcombine.low %v1170_v55, %v1177_v3  ;;  %v4914_v22 = vcombine.high %v1170_v55, %v1177_v3  ;;  %v2543_v21 = vcombine.low %v6792_v40, %v6872_v9 }
 0x2ac   : > { %v1690_v35 = vcombine.low %v1186_v5, %v1193_v7  ;;  %v4915_v53 = vcombine.high %v1186_v5, %v1193_v7  ;;  %v1742_v43 = vcombine.low %v1238_v59, %v1245_v39  ;;  %v4916_v36 = vcombine.high %v1238_v59, %v1245_v39 }
 0x2ad   : > { %v1758_v32 = vcombine.low %v1254_v48, %v1261_v29  ;;  %v4917_v41 = vcombine.high %v1254_v48, %v1261_v29  ;;  %v1681_v34 = vrot.slane %v1674_v54, %v6031_v45  ;;  %v1689_v50 = vrot.slane %v4914_v22, %v6031_v45  ;;  %v3368_v54 = vpop.permute.xlu0 %3367 }
 0x2ae   : > { %v1697_v60 = vrot.slane %v1690_v35, %v6031_v45  ;;  %v1705_v26 = vrot.slane %v4915_v53, %v6031_v45  ;;  %v1749_v33 = vrot.slane %v1742_v43, %v6031_v45  ;;  %v1757_v12 = vrot.slane %v4916_v36, %v6031_v45  ;;  %v6886_v36 = vpop.permute.xlu1 %3369 }
 0x2af   : > { %v1765_v8 = vrot.slane %v1758_v32, %v6031_v45  ;;  %v1773_v24 = vrot.slane %v4917_v41, %v6031_v45  ;;  %v1706_v16 = vcombine.low %v1681_v34, %v1689_v50  ;;  %v1707_v31 = vcombine.high %v1681_v34, %v1689_v50 }
 0x2b0   : > { %v1722_v10 = vcombine.low %v1697_v60, %v1705_v26  ;;  %v1723_v6 = vcombine.high %v1697_v60, %v1705_v26  ;;  %v1774_v63 = vcombine.low %v1749_v33, %v1757_v12  ;;  %v1775_v23 = vcombine.high %v1749_v33, %v1757_v12 }
 0x2b1   : > { %v1790_v19 = vcombine.low %v1765_v8, %v1773_v24  ;;  %v1791_v52 = vcombine.high %v1765_v8, %v1773_v24  ;;  %v1714_v18 = vrot.slane %v1706_v16, %v6034_v49  ;;  %v1721_v47 = vrot.slane %v1707_v31, %v6034_v49 }
 0x2b2   : > { %v1730_v13 = vrot.slane %v1722_v10, %v6034_v49  ;;  %v1737_v42 = vrot.slane %v1723_v6, %v6034_v49  ;;  %v1782_v17 = vrot.slane %v1774_v63, %v6034_v49  ;;  %v1789_v56 = vrot.slane %v1775_v23, %v6034_v49 }
 0x2b3   : > { %v1798_v11 = vrot.slane %v1790_v19, %v6034_v49  ;;  %v1805_v28 = vrot.slane %v1791_v52, %v6034_v49  ;;  %v2535_v32 = vrot.slane %v2527_v2, %v6031_v45  ;;  %v6912_v41 = vrot.slane %v2528_v4, %v6031_v45 }
 0x2b4   : > { %v1738_v51 = vcombine.low %v1714_v18, %v1730_v13  ;;  %v1739_v37 = vcombine.high %v1714_v18, %v1730_v13  ;;  %v1740_v61 = vcombine.low %v1721_v47, %v1737_v42  ;;  %v1741_v15 = vcombine.high %v1721_v47, %v1737_v42 }
 0x2b5   : > { %v1806_v55 = vcombine.low %v1782_v17, %v1798_v11  ;;  %v1807_v3 = vcombine.high %v1782_v17, %v1798_v11  ;;  %v1808_v5 = vcombine.low %v1789_v56, %v1805_v28  ;;  %v1809_v7 = vcombine.high %v1789_v56, %v1805_v28 }
 0x2b6   : > { %v5064_v59 = vpack.c.bf16 %v1738_v51, %v1738_v51  ;;  %v5072_v39 = vpack.c.bf16 %v1739_v37, %v1739_v37  ;;  %v5080_v48 = vpack.c.bf16 %v1740_v61, %v1740_v61  ;;  %v5088_v29 = vpack.c.bf16 %v1741_v15, %v1741_v15 }
 0x2b7   : > { %v5065_v22 = vpack.c.bf16 %v1806_v55, %v1806_v55  ;;  %v5073_v35 = vpack.c.bf16 %v1807_v3, %v1807_v3  ;;  %v5081_v53 = vpack.c.bf16 %v1808_v5, %v1808_v5  ;;  %v5089_v43 = vpack.c.bf16 %v1809_v7, %v1809_v7 }
 0x2b8   : > { %1945 = vst.msk [vmem:[%s6114_s7 + $0x18] sm:$0xf] %vm1938_vm0, %v5064_v59  ;;  %1953 = vst.msk [vmem:[%s6114_s7 + $0x38] sm:$0xf] %vm1938_vm0, %v5072_v39  ;;  %v2475_v34 = vcombine.low %v6790_v1, %v2040_v25  ;;  %v2476_v50 = vcombine.high %v6790_v1, %v2040_v25  ;;  %v2544_v46 = vcombine.high %v6792_v40, %v6872_v9 }
 0x2b9   : > { %1961 = vst.msk [vmem:[%s6114_s7 + $0x58] sm:$0xf] %vm1938_vm0, %v5080_v48  ;;  %1969 = vst.msk [vmem:[%s6114_s7 + $0x78] sm:$0xf] %vm1938_vm0, %v5088_v29  ;;  %v3803_v2 = vcombine.low %v6326_v58, %v3368_v54  ;;  %v3804_v1 = vcombine.high %v6326_v58, %v3368_v54  ;;  %v3871_v26 = vcombine.low %v6328_v62, %v6886_v36 }
 0x2ba   : > { %1946 = vst.msk [vmem:[%s6114_s7 + $0x1c] sm:$0xf] %vm1938_vm0, %v5065_v22  ;;  %1954 = vst.msk [vmem:[%s6114_s7 + $0x3c] sm:$0xf] %vm1938_vm0, %v5073_v35  ;;  %v2483_v4 = vrot.slane %v2475_v34, %v6031_v45  ;;  %v2490_v60 = vrot.slane %v2476_v50, %v6031_v45  ;;  %v3872_v33 = vcombine.high %v6328_v62, %v6886_v36 }
 0x2bb   : > { %1962 = vst.msk [vmem:[%s6114_s7 + $0x5c] sm:$0xf] %vm1938_vm0, %v5081_v53  ;;  %1970 = vst.msk [vmem:[%s6114_s7 + $0x7c] sm:$0xf] %vm1938_vm0, %v5089_v43  ;;  %s5421_s7 = scalar_lea.vmem %s5420_s29, 4096 }
 0x2bc   : > { %p5423_p12 = scmp.lt.s32.totalorder %s5421_s7, %s5415_s26 }
 0x2be   : > { %p5424_p0 = por %p5423_p12, %p5422_p7 }
 0x2c0   : > { %p5425_p1 = pnand %p5424_p0, %p5418_p5 }
 0x2c2   : > { %5428 = shalt.err (!%p5425_p1)
}
 0x2c3   : > { %s5429_s21 = scalar_lea.hbm %s6892_s8, 2048  ;;  %s5433_s30 = scalar_lea.hbm %s7182_s3, 4096 }
 0x2c4   : > { %p5430_p6 = scmp.ne.s32.totalorder %s6892_s8, %s5429_s21  ;;  %p5434_p4 = scmp.lt.u32.totalorder %s6892_s8, %s7182_s3 }
 0x2c5   : > { %p5435_p9 = scmp.lt.u32.totalorder %s5433_s30, %s5429_s21  ;;  %p5437_p11 = scmp.lt.u32.totalorder %s5429_s21, %s6892_s8 }
 0x2c6   : > { %p5431_p10 = pnand %p5430_p6, %p7199_p2 }
 0x2c7   : > { %p5436_p8 = por %p5435_p9, %p5434_p4 }
 0x2c8   : > { %p5432_p3 = pneg %p5431_p10 }
 0x2c9   : > { %p5438_p13 = por %p5437_p11, %p5436_p8 }
 0x2cb   : > { %p5439_p5 = pnand %p5438_p13, %p5432_p3 }
 0x2cd   : > { %5442 = shalt.err (!%p5439_p5)
}
 0x2ce   : > { %s5577_s26 = smov 4   ;;  %s7200_s7 = scalar_lea.sflag [#allocation4], %s5797_s17  ;;  %v2551_v58 = vrot.slane %v2543_v21, %v6031_v45  ;;  %v2558_v40 = vrot.slane %v2544_v46, %v6031_v45  ;;  %v6966_v12 = vrot.slane %v3803_v2, %v6031_v45  ;;  %v6969_v8 = vrot.slane %v3804_v1, %v6031_v45 }
 0x2cf   : > { %5203 = dma.vmem_to_hbm [thread:$0]  (%p7199_p2), %s6894_s15, 2048, %s6892_s8, %s7200_s7, %s5572_s28, %s5572_s28, %s5577_s26   ;;  %v2491_v24 = vcombine.low %v6847_v57, %v2483_v4  ;;  %v2492_v16 = vcombine.high %v6847_v57, %v2483_v4  ;;  %v2507_v31 = vcombine.low %v6850_v38, %v2490_v60  ;;  %v2508_v10 = vcombine.high %v6850_v38, %v2490_v60 }
 0x2d0   : > { %v2559_v6 = vcombine.low %v2535_v32, %v2551_v58  ;;  %v2560_v25 = vcombine.high %v2535_v32, %v2551_v58  ;;  %v2575_v63 = vcombine.low %v6912_v41, %v2558_v40  ;;  %v2576_v23 = vcombine.high %v6912_v41, %v2558_v40  ;;  %s4632_s25 = sand.u32 1, %s5641_s24   ;;  %s4671_s17 = sshll.u32 %s6236_s16, 4  ;;  %s7009_s17 = int_to_ptr.vmem [resolvable:$true] %s4671_s17 }
 0x2d1   : > { %v2499_v19 = vrot.slane %v2491_v24, %v6034_v49  ;;  %v2506_v52 = vrot.slane %v2492_v16, %v6034_v49  ;;  %v2515_v9 = vrot.slane %v2507_v31, %v6034_v49  ;;  %v2522_v18 = vrot.slane %v2508_v10, %v6034_v49  ;;  %s7007_s13 = scalar_lea.hbm %s7183_s4, %s6883_s11  ;;  %s5443_s21 = scalar_lea.vmem %s7009_s17, 2048 }
 0x2d2   : > { %v2567_v57 = vrot.slane %v2559_v6, %v6034_v49  ;;  %v2574_v47 = vrot.slane %v2560_v25, %v6034_v49  ;;  %v2583_v38 = vrot.slane %v2575_v63, %v6034_v49  ;;  %v2590_v13 = vrot.slane %v2576_v23, %v6034_v49  ;;  %p5444_p7 = scmp.ne.s32.totalorder %s7009_s17, %s5443_s21  ;;  %s5578_s12 = smov [#allocation9]  }
 0x2d3   : > { %v3003_v42 = vcombine.low %v2499_v19, %v2506_v52  ;;  %v4962_v17 = vcombine.high %v2499_v19, %v2506_v52  ;;  %v3019_v56 = vcombine.low %v2515_v9, %v2522_v18  ;;  %v4963_v11 = vcombine.high %v2515_v9, %v2522_v18  ;;  %s5447_s30 = sshll.u32 %s5578_s12, 4  ;;  %s5448_s30 = int_to_ptr.vmem [resolvable:$false] %s5447_s30 }
 0x2d4   : > { %v3071_v28 = vcombine.low %v2567_v57, %v2574_v47  ;;  %v4964_v51 = vcombine.high %v2567_v57, %v2574_v47  ;;  %v3087_v37 = vcombine.low %v2583_v38, %v2590_v13  ;;  %v4965_v61 = vcombine.high %v2583_v38, %v2590_v13  ;;  %p5445_p12 = pnand %p5444_p7, %p7199_p2  ;;  %s5449_s29 = scalar_lea.vmem %s5448_s30, 4096 }
 0x2d5   : > { %v3010_v15 = vrot.slane %v3003_v42, %v6031_v45  ;;  %v3018_v55 = vrot.slane %v4962_v17, %v6031_v45  ;;  %v3026_v3 = vrot.slane %v3019_v56, %v6031_v45  ;;  %v3034_v5 = vrot.slane %v4963_v11, %v6031_v45  ;;  %p5450_p1 = scmp.lt.s32.totalorder %s7009_s17, %s5448_s30  ;;  %p5451_p6 = scmp.lt.s32.totalorder %s5449_s29, %s5443_s21 }
 0x2d6   : > { %v3078_v7 = vrot.slane %v3071_v28, %v6031_v45  ;;  %v3086_v59 = vrot.slane %v4964_v51, %v6031_v45  ;;  %v3094_v39 = vrot.slane %v3087_v37, %v6031_v45  ;;  %v3102_v48 = vrot.slane %v4965_v61, %v6031_v45  ;;  %p5446_p0 = pneg %p5445_p12 }
 0x2d7   : > { %v3035_v29 = vcombine.low %v3010_v15, %v3018_v55  ;;  %v3036_v54 = vcombine.high %v3010_v15, %v3018_v55  ;;  %v3051_v22 = vcombine.low %v3026_v3, %v3034_v5  ;;  %v3052_v35 = vcombine.high %v3026_v3, %v3034_v5  ;;  %p5452_p10 = por %p5451_p6, %p5450_p1 }
 0x2d8   : > { %v3103_v53 = vcombine.low %v3078_v7, %v3086_v59  ;;  %v3104_v43 = vcombine.high %v3078_v7, %v3086_v59  ;;  %v3119_v32 = vcombine.low %v3094_v39, %v3102_v48  ;;  %v3120_v41 = vcombine.high %v3094_v39, %v3102_v48 }
 0x2d9   : > { %v3043_v34 = vrot.slane %v3035_v29, %v6034_v49  ;;  %v3050_v50 = vrot.slane %v3036_v54, %v6034_v49  ;;  %v3059_v21 = vrot.slane %v3051_v22, %v6034_v49  ;;  %v3066_v46 = vrot.slane %v3052_v35, %v6034_v49  ;;  %p5453_p3 = pnand %p5452_p10, %p5446_p0 }
 0x2da   : > { %v3111_v2 = vrot.slane %v3103_v53, %v6034_v49  ;;  %v3118_v1 = vrot.slane %v3104_v43, %v6034_v49  ;;  %v3127_v4 = vrot.slane %v3119_v32, %v6034_v49  ;;  %v3134_v60 = vrot.slane %v3120_v41, %v6034_v49 }
 0x2db   : > { %v3067_v58 = vcombine.low %v3043_v34, %v3059_v21  ;;  %v3068_v40 = vcombine.high %v3043_v34, %v3059_v21  ;;  %v3069_v24 = vcombine.low %v3050_v50, %v3066_v46  ;;  %v3070_v16 = vcombine.high %v3050_v50, %v3066_v46 }
 0x2dc   : > { %v3135_v31 = vcombine.low %v3111_v2, %v3127_v4  ;;  %v3136_v10 = vcombine.high %v3111_v2, %v3127_v4  ;;  %v3137_v6 = vcombine.low %v3118_v1, %v3134_v60  ;;  %v3138_v25 = vcombine.high %v3118_v1, %v3134_v60 }
 0x2dd   : > { %v5096_v63 = vpack.c.bf16 %v3067_v58, %v3067_v58  ;;  %v5104_v23 = vpack.c.bf16 %v3068_v40, %v3068_v40  ;;  %v5112_v19 = vpack.c.bf16 %v3069_v24, %v3069_v24  ;;  %v5120_v52 = vpack.c.bf16 %v3070_v16, %v3070_v16 }
 0x2de   : > { %v5097_v9 = vpack.c.bf16 %v3135_v31, %v3135_v31  ;;  %v5105_v18 = vpack.c.bf16 %v3136_v10, %v3136_v10  ;;  %v5113_v57 = vpack.c.bf16 %v3137_v6, %v3137_v6  ;;  %v5121_v47 = vpack.c.bf16 %v3138_v25, %v3138_v25 }
 0x2df   : > { %3273 = vst.msk [vmem:[%s6236_s16 + $0x18] sm:$0xf] %vm1938_vm0, %v5096_v63  ;;  %3281 = vst.msk [vmem:[%s6236_s16 + $0x38] sm:$0xf] %vm1938_vm0, %v5104_v23  ;;  %v3819_v38 = vcombine.low %v6451_v20, %v6966_v12  ;;  %v3820_v13 = vcombine.high %v6451_v20, %v6966_v12  ;;  %v3835_v42 = vcombine.low %v6454_v0, %v6969_v8 }
 0x2e0   : > { %3289 = vst.msk [vmem:[%s6236_s16 + $0x58] sm:$0xf] %vm1938_vm0, %v5112_v19  ;;  %3297 = vst.msk [vmem:[%s6236_s16 + $0x78] sm:$0xf] %vm1938_vm0, %v5120_v52  ;;  %v3836_v17 = vcombine.high %v6454_v0, %v6969_v8  ;;  %v3863_v56 = vrot.slane %v3855_v14, %v6031_v45  ;;  %v3870_v11 = vrot.slane %v3856_v44, %v6031_v45 }
 0x2e1   : > { %3274 = vst.msk [vmem:[%s6236_s16 + $0x1c] sm:$0xf] %vm1938_vm0, %v5097_v9  ;;  %3282 = vst.msk [vmem:[%s6236_s16 + $0x3c] sm:$0xf] %vm1938_vm0, %v5105_v18  ;;  %v3879_v20 = vrot.slane %v3871_v26, %v6031_v45  ;;  %v3886_v27 = vrot.slane %v3872_v33, %v6031_v45  ;;  %v3827_v30 = vrot.slane %v3819_v38, %v6034_v49 }
 0x2e2   : > { %3290 = vst.msk [vmem:[%s6236_s16 + $0x5c] sm:$0xf] %vm1938_vm0, %v5113_v57  ;;  %3298 = vst.msk [vmem:[%s6236_s16 + $0x7c] sm:$0xf] %vm1938_vm0, %v5121_v47  ;;  %v3834_v0 = vrot.slane %v3820_v13, %v6034_v49  ;;  %v3843_v14 = vrot.slane %v3835_v42, %v6034_v49  ;;  %v3850_v44 = vrot.slane %v3836_v17, %v6034_v49  ;;  %s7057_s16 = scalar_lea.sflag [#allocation10], %s4632_s25 }
 0x2e3   : > { %5456 = shalt.err (!%p5453_p3)
}
 0x2e4   : > { %s5457_s24 = scalar_lea.hbm %s7007_s13, 2048  ;;  %s5461_s15 = scalar_lea.hbm %s7183_s4, 4096 }
 0x2e5   : > { %p5458_p4 = scmp.ne.s32.totalorder %s7007_s13, %s5457_s24  ;;  %p5462_p11 = scmp.lt.u32.totalorder %s7007_s13, %s7183_s4 }
 0x2e6   : > { %p5463_p13 = scmp.lt.u32.totalorder %s5461_s15, %s5457_s24  ;;  %p5465_p7 = scmp.lt.u32.totalorder %s5457_s24, %s7007_s13 }
 0x2e7   : > { %p5459_p9 = pnand %p5458_p4, %p7199_p2 }
 0x2e8   : > { %p5464_p5 = por %p5463_p13, %p5462_p11 }
 0x2e9   : > { %p5460_p8 = pneg %p5459_p9 }
 0x2ea   : > { %p5466_p12 = por %p5465_p7, %p5464_p5 }
 0x2ec   : > { %p5467_p0 = pnand %p5466_p12, %p5460_p8 }
 0x2ee   : > { %5470 = shalt.err (!%p5467_p0)
}
 0x2ef   : > { %5204 = dma.vmem_to_hbm [thread:$0]  (%p7199_p2), %s7009_s17, 2048, %s7007_s13, %s7057_s16, %s5572_s28, %s5572_s28, %s5577_s26   ;;  %v3887_v62 = vcombine.low %v3863_v56, %v3879_v20  ;;  %v3888_v36 = vcombine.high %v3863_v56, %v3879_v20  ;;  %v3903_v26 = vcombine.low %v3870_v11, %v3886_v27  ;;  %v3904_v33 = vcombine.high %v3870_v11, %v3886_v27 }
 0x2f0   : > { %v4331_v12 = vcombine.low %v3827_v30, %v3834_v0  ;;  %v5010_v8 = vcombine.high %v3827_v30, %v3834_v0  ;;  %v4347_v28 = vcombine.low %v3843_v14, %v3850_v44  ;;  %v5011_v51 = vcombine.high %v3843_v14, %v3850_v44  ;;  %s4689_s17 = sshll.u32 %s6157_s10, 4  ;;  %s7117_s30 = scalar_lea.hbm %s7184_s5, %s6883_s11  ;;  %s7119_s17 = int_to_ptr.vmem [resolvable:$true] %s4689_s17 }
 0x2f1   : > { %v3895_v37 = vrot.slane %v3887_v62, %v6034_v49  ;;  %v3902_v61 = vrot.slane %v3888_v36, %v6034_v49  ;;  %v3911_v15 = vrot.slane %v3903_v26, %v6034_v49  ;;  %v3918_v55 = vrot.slane %v3904_v33, %v6034_v49  ;;  %s5471_s29 = scalar_lea.vmem %s7119_s17, 2048  ;;  %s5579_s11 = smov [#allocation11]  }
 0x2f2   : > { %v4338_v3 = vrot.slane %v4331_v12, %v6031_v45  ;;  %v4346_v5 = vrot.slane %v5010_v8, %v6031_v45  ;;  %v4354_v7 = vrot.slane %v4347_v28, %v6031_v45  ;;  %v4362_v59 = vrot.slane %v5011_v51, %v6031_v45  ;;  %p5472_p1 = scmp.ne.s32.totalorder %s7119_s17, %s5471_s29  ;;  %s5475_s24 = sshll.u32 %s5579_s11, 4  ;;  %s5476_s24 = int_to_ptr.vmem [resolvable:$false] %s5475_s24 }
 0x2f3   : > { %v4399_v39 = vcombine.low %v3895_v37, %v3902_v61  ;;  %v5012_v48 = vcombine.high %v3895_v37, %v3902_v61  ;;  %v4415_v29 = vcombine.low %v3911_v15, %v3918_v55  ;;  %v5013_v54 = vcombine.high %v3911_v15, %v3918_v55  ;;  %s5477_s7 = scalar_lea.vmem %s5476_s24, 4096  ;;  %p5478_p3 = scmp.lt.s32.totalorder %s7119_s17, %s5476_s24 }
 0x2f4   : > { %v4363_v22 = vcombine.low %v4338_v3, %v4346_v5  ;;  %v4364_v35 = vcombine.high %v4338_v3, %v4346_v5  ;;  %v4379_v53 = vcombine.low %v4354_v7, %v4362_v59  ;;  %v4380_v43 = vcombine.high %v4354_v7, %v4362_v59  ;;  %p5473_p6 = pnand %p5472_p1, %p7199_p2  ;;  %p5479_p4 = scmp.lt.s32.totalorder %s5477_s7, %s5471_s29 }
 0x2f5   : > { %v4406_v32 = vrot.slane %v4399_v39, %v6031_v45  ;;  %v4414_v41 = vrot.slane %v5012_v48, %v6031_v45  ;;  %v4422_v34 = vrot.slane %v4415_v29, %v6031_v45  ;;  %v4430_v50 = vrot.slane %v5013_v54, %v6031_v45 }
 0x2f6   : > { %v4371_v21 = vrot.slane %v4363_v22, %v6034_v49  ;;  %v4378_v46 = vrot.slane %v4364_v35, %v6034_v49  ;;  %v4387_v2 = vrot.slane %v4379_v53, %v6034_v49  ;;  %v4394_v1 = vrot.slane %v4380_v43, %v6034_v49  ;;  %p5474_p10 = pneg %p5473_p6  ;;  %p5480_p9 = por %p5479_p4, %p5478_p3 }
 0x2f7   : > { %v4431_v4 = vcombine.low %v4406_v32, %v4414_v41  ;;  %v4432_v60 = vcombine.high %v4406_v32, %v4414_v41  ;;  %v4447_v58 = vcombine.low %v4422_v34, %v4430_v50  ;;  %v4448_v40 = vcombine.high %v4422_v34, %v4430_v50 }
 0x2f8   : > { %v4395_v24 = vcombine.low %v4371_v21, %v4387_v2  ;;  %v4396_v16 = vcombine.high %v4371_v21, %v4387_v2  ;;  %v4397_v31 = vcombine.low %v4378_v46, %v4394_v1  ;;  %v4398_v10 = vcombine.high %v4378_v46, %v4394_v1  ;;  %p5481_p8 = pnand %p5480_p9, %p5474_p10 }
 0x2f9   : > { %v4439_v45 = vrot.slane %v4431_v4, %v6034_v49  ;;  %v4446_v6 = vrot.slane %v4432_v60, %v6034_v49  ;;  %v4455_v25 = vrot.slane %v4447_v58, %v6034_v49  ;;  %v4462_v63 = vrot.slane %v4448_v40, %v6034_v49 }
 0x2fa   : > { %v5128_v23 = vpack.c.bf16 %v4395_v24, %v4395_v24  ;;  %v5136_v19 = vpack.c.bf16 %v4396_v16, %v4396_v16  ;;  %v5144_v52 = vpack.c.bf16 %v4397_v31, %v4397_v31  ;;  %v5152_v9 = vpack.c.bf16 %v4398_v10, %v4398_v10 }
 0x2fb   : > { %v4463_v18 = vcombine.low %v4439_v45, %v4455_v25  ;;  %v4464_v57 = vcombine.high %v4439_v45, %v4455_v25  ;;  %v4465_v47 = vcombine.low %v4446_v6, %v4462_v63  ;;  %v4466_v38 = vcombine.high %v4446_v6, %v4462_v63 }
 0x2fc   : > { %4601 = vst.msk [vmem:[%s6157_s10 + $0x18] sm:$0xf] %vm1938_vm0, %v5128_v23  ;;  %4609 = vst.msk [vmem:[%s6157_s10 + $0x38] sm:$0xf] %vm1938_vm0, %v5136_v19 }
 0x2fd   : > { %4617 = vst.msk [vmem:[%s6157_s10 + $0x58] sm:$0xf] %vm1938_vm0, %v5144_v52  ;;  %4625 = vst.msk [vmem:[%s6157_s10 + $0x78] sm:$0xf] %vm1938_vm0, %v5152_v9  ;;  %v5129_v49 = vpack.c.bf16 %v4463_v18, %v4463_v18  ;;  %v5137_v13 = vpack.c.bf16 %v4464_v57, %v4464_v57  ;;  %v5145_v42 = vpack.c.bf16 %v4465_v47, %v4465_v47 }
 0x2fe   : > { %v5153_v17 = vpack.c.bf16 %v4466_v38, %v4466_v38 }
 0x2ff   : > { %4602 = vst.msk [vmem:[%s6157_s10 + $0x1c] sm:$0xf] %vm1938_vm0, %v5129_v49  ;;  %4610 = vst.msk [vmem:[%s6157_s10 + $0x3c] sm:$0xf] %vm1938_vm0, %v5137_v13 }
 0x300   : > { %4618 = vst.msk [vmem:[%s6157_s10 + $0x5c] sm:$0xf] %vm1938_vm0, %v5145_v42  ;;  %4626 = vst.msk [vmem:[%s6157_s10 + $0x7c] sm:$0xf] %vm1938_vm0, %v5153_v17 }
 0x301   : > { %5484 = shalt.err (!%p5481_p8)
}
 0x302   : > { %s5485_s10 = scalar_lea.hbm %s7117_s30, 2048  ;;  %s5489_s8 = scalar_lea.hbm %s7184_s5, 4096 }
 0x303   : > { %p5486_p11 = scmp.ne.s32.totalorder %s7117_s30, %s5485_s10  ;;  %p5490_p7 = scmp.lt.u32.totalorder %s7117_s30, %s7184_s5 }
 0x304   : > { %p5491_p12 = scmp.lt.u32.totalorder %s5489_s8, %s5485_s10  ;;  %p5493_p1 = scmp.lt.u32.totalorder %s5485_s10, %s7117_s30 }
 0x305   : > { %p5487_p13 = pnand %p5486_p11, %p7199_p2 }
 0x306   : > { %p5492_p0 = por %p5491_p12, %p5490_p7 }
 0x307   : > { %p5488_p5 = pneg %p5487_p13 }
 0x308   : > { %p5494_p6 = por %p5493_p1, %p5492_p0 }
 0x30a   : > { %p5495_p10 = pnand %p5494_p6, %p5488_p5 }
 0x30c   : > { %5498 = shalt.err (!%p5495_p10)
}
 0x30d   : > { %5205 = dma.vmem_to_hbm [thread:$0]  (%p7199_p2), %s7119_s17, 2048, %s7117_s30, %s7057_s16, %s5572_s28, %s5572_s28, %s5577_s26  }
 0x30e PF: > { %s4704_s21 = sand.u32 1, %s5541_s18   ;;  %p7201_p3 = scmp.ne.s32.totalorder %s7190_s27, 0 }
 0x30f   : > { %p7202_p4 = scmp.ge.s32.totalorder %s5561_s23, 2  ;;  %s4705_s29 = scalar_lea.sflag [#allocation4], %s4704_s21 }
 0x311   : > { %p5221_p9 = pnand %p7202_p4, %p7201_p3 }
 0x313   : > { %5532 = dma.done.wait (!%p5221_p9), %s4705_s29, 2048  }
 0x314   : > { %5534 = vsyncadd (!%p5221_p9), %s4705_s29, 4294965248  ;;  %s7203_s6 = sadd.s32 4294967294, %s5561_s23  }
 0x315   : > { %s4713_s11 = sand.u32 1, %s7203_s6  }
 0x316   : > { %s4714_s24 = scalar_lea.sflag [#allocation10], %s4713_s11 }
 0x317   : > { %5536 = dma.done.wait (!%p5221_p9), %s4714_s24, 4096  }
 0x318   : > { %5538 = vsyncadd (!%p5221_p9), %s4714_s24, 4294963200  ;;  %s26_s23 = sadd.s32 1, %s5561_s23   ;;  %s7204_s18 = smov %s5545_s19 }
 0x319   : > { %p23_p2 = scmp.ge.s32.totalorder %s26_s23, 4   ;;  %s7205_s19 = smov %s5549_s20 }
 0x31a   : > { %s7206_s20 = smov %s5751_s14  ;;  %s7207_s21 = smov %s5557_s22 }
 0x31b   : > { %s7208_s22 = smov %s7210_s9  ;;  %25 = sbr.rel (!%p23_p2) target bundleno = 9 (0x9), region = 117 }
 0x322   :  { %4728 = vsyncpa [#allocation3], 1 }
 0x323   :  { %4730 = vsyncpa [#allocation3 + $0x1], 1 }
 0x324   :  { %4731 = vsyncpa [#allocation6], 1 }
 0x325   :  { %4732 = vsyncpa [#allocation4], 1 }
 0x326   :  { %4734 = vsyncpa [#allocation4 + $0x1], 1 }
 0x327   :  { %4735 = vsyncpa [#allocation10], 1 }
 0x328   :  { %4737 = vsyncpa [#allocation10 + $0x1], 1 }

</bundles_post_ra>
